<compile_context>
chip_gen: v7x
topology: tpu7x:2x2x1
jax: 0.10.0
libtpu: 0.0.40
codegen_flags: <defaults>
</compile_context>

<pallas_src>
import functools

import jax
import jax.numpy as jnp
import numpy as np
from jax import lax
from jax.experimental import pallas as pl
from jax.experimental.pallas import tpu as pltpu

LANES = 128


# ----------------------------------------------------------------------------
# Fused kernel (one grid step == one sentence)
# ----------------------------------------------------------------------------
def _bilstm_crf_kernel(hd, T, K, R, start_idx, end_idx,
                       sent_ref,                            # SMEM (B, T) int32 (scalar prefetch)
                       emb_ref,                             # VMEM (V, E)
                       w_in_f_ref, w_in_r_ref, b_cat_ref,   # (E,8hd) (E,8hd) (1,8hd)
                       w_hh_ref,                            # (2hd, 8hd)
                       h0_ref, c0_ref,                      # (1, 2hd)
                       wtag_ref, btag_ref,                  # (2hd, 128) lane-padded, (1, 128)
                       trans_ref, transT_ref,               # (K, K)
                       out_ref,                             # VMEM (R, 128) merged output slab
                       hidf_vmem, hidr_vmem):               # (T, hd) each
    b = pl.program_id(0)
    H2 = 2 * hd
    V = emb_ref.shape[0]

    # ---- hoisted off-chain loads / constants (nothing below waits on them serially) --
    w_hh = w_hh_ref[...]
    trans = trans_ref[...]
    transT = transT_ref[...]
    b_cat = b_cat_ref[...]
    h = h0_ref[...]                                          # (1, 2hd) = [h_f | h_r]
    c = c0_ref[...]
    lane_iota = lax.broadcasted_iota(jnp.int32, (1, K), 1)
    sub_iota = lax.broadcasted_iota(jnp.int32, (K, 1), 0)
    row_iota = lax.broadcasted_iota(jnp.int32, (K, K), 0)
    col_iota = lax.broadcasted_iota(jnp.int32, (K, K), 1)
    lane128 = lax.broadcasted_iota(jnp.int32, (1, LANES), 1)

    # ---- embedding gather: one-hot matmul against the VMEM-resident table -----------
    sub_T = lax.broadcasted_iota(jnp.int32, (T, V), 0)
    lane_V = lax.broadcasted_iota(jnp.int32, (T, V), 1)
    onehot = jnp.zeros((T, V), jnp.float32)
    for t in range(T):
        onehot = jnp.where((sub_T == t) & (lane_V == sent_ref[b, t]), 1.0, onehot)
    emb = jnp.dot(onehot, emb_ref[...], preferred_element_type=jnp.float32)   # (T, E)

    # ---- hoisted input projections (off the recurrent serial chain) ------------------
    # gate column layout: [i_f i_r f_f f_r 2g_f 2g_r o_f o_r]  (g pre-scaled x2 so
    # tanh(g) = 2*sigmoid(2g) - 1 -> single sigmoid pass per step)
    gin_f = jnp.dot(emb, w_in_f_ref[...], preferred_element_type=jnp.float32) + b_cat
    gin_r = jnp.dot(emb, w_in_r_ref[...], preferred_element_type=jnp.float32)

    # ---- fused fwd+bwd LSTM recurrence: one (1,2hd)@(2hd,8hd) matmul + one sigmoid ---
    for t in range(T):                                       # fully unrolled (small T)
        tr = T - 1 - t                                       # static reversed time index
        z = (gin_f[t:t + 1, :] + gin_r[tr:tr + 1, :]
             + jnp.dot(h, w_hh, preferred_element_type=jnp.float32))
        s = jax.nn.sigmoid(z)                                # single EUP pass (1, 8hd)
        i_g = s[:, 0 * H2:1 * H2]
        f_g = s[:, 1 * H2:2 * H2]
        g_g = 2.0 * s[:, 2 * H2:3 * H2] - 1.0                # tanh(g)
        o_g = s[:, 3 * H2:4 * H2]
        c = f_g * c + i_g * g_g
        h = o_g * jnp.tanh(c)
        hidf_vmem[pl.ds(t, 1), :] = h[:, 0:hd]               # forward dir at time t
        hidr_vmem[pl.ds(tr, 1), :] = h[:, hd:H2]             # backward dir at time T-1-t

    # ---- hidden2tag (lane-padded weights -> feats comes out 128 lanes wide) ----------
    feats_wide = (jnp.dot(hidf_vmem[...], wtag_ref[0:hd, :], preferred_element_type=jnp.float32)
                  + jnp.dot(hidr_vmem[...], wtag_ref[hd:H2, :], preferred_element_type=jnp.float32)
                  + btag_ref[...])                           # (T, 128); lanes >= K are zero

    # ---- Viterbi forward pass ---------------------------------------------------------
    # Alternating layouts: even steps take fv as a (1,K) row -> (K,1) column; odd steps
    # column -> row.  The serial chain never contains a relayout of the recurrent value.
    neg = jnp.float32(-10000.0)

    def row_to_col(row):
        d = jnp.where(row_iota == col_iota, jnp.broadcast_to(row, (K, K)), 0.0)
        return jnp.sum(d, axis=1, keepdims=True)

    fv = jnp.where(lane_iota == start_idx, 0.0, neg)         # (1, K)
    fv_is_row = True
    bp_list = []
    for t in range(T):
        emit = feats_wide[t:t + 1, 0:K]
        if fv_is_row:                                        # prev tag on lanes
            m = jnp.broadcast_to(fv, (K, K)) + trans         # m[j,i] = fv[i] + trans[j,i]
            u = jnp.max(m, axis=1, keepdims=True)            # (K, 1)
            bp = jnp.min(jnp.where(m == u, col_iota, K), axis=1, keepdims=True)
            fv = u + row_to_col(emit)                        # column
        else:                                                # prev tag on sublanes
            m = jnp.broadcast_to(fv, (K, K)) + transT        # m[i,j] = fv[i] + trans[j,i]
            u = jnp.max(m, axis=0, keepdims=True)            # (1, K)
            bp = jnp.min(jnp.where(m == u, row_iota, K), axis=0, keepdims=True)
            fv = u + emit                                    # row
        fv_is_row = not fv_is_row
        bp_list.append(bp)

    if fv_is_row:                                            # terminal transition
        term = fv + trans[end_idx:end_idx + 1, :]
        best_score = jnp.max(term, axis=1, keepdims=True)
        best_tag = jnp.min(jnp.where(term == best_score, lane_iota, K), axis=1, keepdims=True)
    else:
        term = fv + transT[:, end_idx:end_idx + 1]
        best_score = jnp.max(term, axis=0, keepdims=True)
        best_tag = jnp.min(jnp.where(term == best_score, sub_iota, K), axis=0, keepdims=True)

    # ---- backtrack, fully in registers ------------------------------------------------
    def bp_lookup(bp, cur):
        if bp.shape[0] == 1:                                 # (1, K) row
            return jnp.sum(jnp.where(lane_iota == cur, bp, 0), axis=1, keepdims=True)
        return jnp.sum(jnp.where(sub_iota == cur, bp, 0), axis=0, keepdims=True)

    cur = best_tag                                           # (1, 1) int32
    path_vals = [None] * T
    path_vals[T - 1] = cur
    for t in range(T - 1, 0, -1):
        cur = bp_lookup(bp_list[t], cur)
        path_vals[t - 1] = cur
    check = bp_lookup(bp_list[0], cur)                       # must equal <START>

    # ---- single merged, lane-dense output slab ----------------------------------------
    meta = jnp.where(lane128 == 0, best_score, 0.0)
    meta = jnp.where(lane128 == 1, check.astype(jnp.float32), meta)
    path_row = jnp.zeros((1, LANES), jnp.float32)
    for t in range(T):
        path_row = jnp.where(lane128 == t, path_vals[t].astype(jnp.float32), path_row)

    out_ref[pl.ds(0, T), :] = feats_wide
    out_ref[pl.ds(T, 1), :] = meta
    out_ref[pl.ds(T + 1, 1), :] = path_row
    if R > T + 2:
        out_ref[pl.ds(T + 2, R - T - 2), :] = jnp.zeros((R - T - 2, LANES), jnp.float32)


# ----------------------------------------------------------------------------
# Wrapper
# ----------------------------------------------------------------------------
def _full_spec(shape):
    nd = len(shape)
    return pl.BlockSpec(shape, lambda b, sent_ref, _nd=nd: (0,) * _nd)


def bilstm_crf_forward(sentences, emb_table, params, start_idx, end_idx):
    """Fused TPU kernel over a batch of sentences; returns per-sentence
    (feats, viterbi score, decoded path, backtracked start tag)."""
    B, T = sentences.shape
    hd = params["w_hh_blk"].shape[0] // 2
    K = params["trans"].shape[0]
    R = ((T + 2 + 7) // 8) * 8                               # sublane-padded slab rows

    tensor_args = (emb_table,
                   params["w_in_f"], params["w_in_r"], params["b_cat"],
                   params["w_hh_blk"], params["h0"], params["c0"],
                   params["w_tag_T"], params["b_tag"],
                   params["trans"], params["transT"])

    grid_spec = pltpu.PrefetchScalarGridSpec(
        num_scalar_prefetch=1,                               # `sentences` lands in SMEM
        grid=(B,),
        in_specs=[_full_spec(a.shape) for a in tensor_args],
        out_specs=pl.BlockSpec((R, LANES), lambda b, sent_ref: (b, 0)),
        scratch_shapes=[pltpu.VMEM((T, hd), jnp.float32),    # h_fwd rows
                        pltpu.VMEM((T, hd), jnp.float32)],   # h_bwd rows (time-reversed)
    )
    out = pl.pallas_call(
        functools.partial(_bilstm_crf_kernel, hd, T, K, R, start_idx, end_idx),
        out_shape=jax.ShapeDtypeStruct((B * R, LANES), jnp.float32),
        grid_spec=grid_spec,
        compiler_params=pltpu.CompilerParams(dimension_semantics=("parallel",)),
    )(sentences, *tensor_args)

    out = out.reshape(B, R, LANES)
    feats = out[:, :T, :K]
    score = out[:, T, 0]
    check = out[:, T, 1].astype(jnp.int32)
    path = out[:, T + 1, :T].astype(jnp.int32)
    return feats, score, path, check


# ----------------------------------------------------------------------------
# Parameter packing (PyTorch layout -> fused kernel layout); plain JAX, host side.
# ----------------------------------------------------------------------------
def _scale_g_cols(w, hd):
    # scale the g-gate block (gate order i,f,g,o) by 2 so tanh(x) = 2*sigmoid(2x) - 1
    return w.at[..., 2 * hd:3 * hd].multiply(2.0)


def _pack_gate_cols(w, hd, slot):
    # spread the 4 gate blocks of `w` (..., 4*hd) into the 8-block fused layout
    # [i_f i_r f_f f_r g_f g_r o_f o_r]; slot 0 = forward dir, slot 1 = reverse dir.
    out = jnp.zeros(w.shape[:-1] + (8 * hd,), w.dtype)
    for k in range(4):
        out = out.at[..., (2 * k + slot) * hd:(2 * k + slot + 1) * hd].set(
            w[..., k * hd:(k + 1) * hd])
    return out


def pack_params(raw, hd):
    w_in_f = _pack_gate_cols(_scale_g_cols(raw["w_ih_f"].T, hd), hd, 0)
    w_in_r = _pack_gate_cols(_scale_g_cols(raw["w_ih_r"].T, hd), hd, 1)
    b_f = _scale_g_cols((raw["b_ih_f"] + raw["b_hh_f"])[None, :], hd)
    b_r = _scale_g_cols((raw["b_ih_r"] + raw["b_hh_r"])[None, :], hd)
    b_cat = _pack_gate_cols(b_f, hd, 0) + _pack_gate_cols(b_r, hd, 1)
    w_hh_blk = jnp.concatenate(
        [_pack_gate_cols(_scale_g_cols(raw["w_hh_f"].T, hd), hd, 0),
         _pack_gate_cols(_scale_g_cols(raw["w_hh_r"].T, hd), hd, 1)], axis=0)
    # hidden2tag weights lane-padded to 128 so feats is produced 128 lanes wide
    w_tag_T = raw["w_tag"].T                                  # (2hd, K)
    K = w_tag_T.shape[1]
    w_tag_pad = jnp.zeros((2 * hd, LANES), w_tag_T.dtype).at[:, :K].set(w_tag_T)
    b_tag_pad = jnp.zeros((1, LANES), raw["b_tag"].dtype).at[0, :K].set(raw["b_tag"])
    return dict(
        w_in_f=w_in_f, w_in_r=w_in_r, b_cat=b_cat, w_hh_blk=w_hh_blk,
        h0=jnp.concatenate([raw["h0"][0], raw["h0"][1]])[None, :],
        c0=jnp.concatenate([raw["c0"][0], raw["c0"][1]])[None, :],
        w_tag_T=w_tag_pad, b_tag=b_tag_pad,
        trans=raw["transitions"], transT=raw["transitions"].T)


# ----------------------------------------------------------------------------
# Pure references for sanity checking (host side only)
# ----------------------------------------------------------------------------
def _ref_feats(embeds, raw):
    def direction(xs, w_ih, w_hh, b_ih, b_hh, h0, c0):
        def step(carry, x):
            h, c = carry
            g = x @ w_ih.T + b_ih + h @ w_hh.T + b_hh
            i_g, f_g, g_g, o_g = jnp.split(g, 4)
            c = jax.nn.sigmoid(f_g) * c + jax.nn.sigmoid(i_g) * jnp.tanh(g_g)
            h = jax.nn.sigmoid(o_g) * jnp.tanh(c)
            return (h, c), h
        _, hs = lax.scan(step, (h0, c0), xs)
        return hs

    hf = direction(embeds, raw["w_ih_f"], raw["w_hh_f"], raw["b_ih_f"],
                   raw["b_hh_f"], raw["h0"][0], raw["c0"][0])
    hr = direction(embeds[::-1], raw["w_ih_r"], raw["w_hh_r"], raw["b_ih_r"],
                   raw["b_hh_r"], raw["h0"][1], raw["c0"][1])[::-1]
    hid = jnp.concatenate([hf, hr], axis=-1)
    return hid @ raw["w_tag"].T + raw["b_tag"]


def _ref_viterbi(feats, trans, start_idx, end_idx):
    feats = np.asarray(feats, np.float32)
    trans = np.asarray(trans, np.float32)
    K = trans.shape[0]
    fv = np.full((K,), -10000.0, np.float32)
    fv[start_idx] = 0.0
    bps = []
    for t in range(feats.shape[0]):
        m = fv[None, :] + trans                 # m[j, i]
        bps.append(np.argmax(m, axis=1))
        fv = m.max(axis=1) + feats[t]
    term = fv + trans[end_idx]
    best = int(np.argmax(term))
    score = float(term[best])
    path = [best]
    for bp in reversed(bps):
        best = int(bp[best])
        path.append(best)
    start = path.pop()
    path.reverse()
    return score, path, start


# ----------------------------------------------------------------------------
if __name__ == "__main__":
    vocab_size, embedding_dim, hidden_dim = 50, 16, 32
    tag_to_ix = {"B": 0, "I": 1, "O": 2, "<START>": 3, "<STOP>": 4}
    start_tag, end_tag = "<START>", "<STOP>"
    K = len(tag_to_ix)
    T = 8
    B = 2
    Hd = hidden_dim // 2

    keys = jax.random.split(jax.random.PRNGKey(0), 16)
    emb_table = jax.random.normal(keys[0], (vocab_size, embedding_dim), jnp.float32)
    w_ih_f = 0.1 * jax.random.normal(keys[1], (4 * Hd, embedding_dim), jnp.float32)
    w_hh_f = 0.1 * jax.random.normal(keys[2], (4 * Hd, Hd), jnp.float32)
    b_ih_f = 0.1 * jax.random.normal(keys[3], (4 * Hd,), jnp.float32)
    b_hh_f = 0.1 * jax.random.normal(keys[4], (4 * Hd,), jnp.float32)
    w_ih_r = 0.1 * jax.random.normal(keys[5], (4 * Hd, embedding_dim), jnp.float32)
    w_hh_r = 0.1 * jax.random.normal(keys[6], (4 * Hd, Hd), jnp.float32)
    b_ih_r = 0.1 * jax.random.normal(keys[7], (4 * Hd,), jnp.float32)
    b_hh_r = 0.1 * jax.random.normal(keys[8], (4 * Hd,), jnp.float32)
    w_tag = 0.1 * jax.random.normal(keys[9], (K, hidden_dim), jnp.float32)
    b_tag = 0.1 * jax.random.normal(keys[10], (K,), jnp.float32)
    transitions = jax.random.normal(keys[11], (K, K), jnp.float32)
    transitions = transitions.at[tag_to_ix[start_tag], :].set(-10000.0)
    transitions = transitions.at[:, tag_to_ix[end_tag]].set(-10000.0)
    h0 = jax.random.normal(keys[12], (2, Hd), jnp.float32)     # init_hidden()
    c0 = jax.random.normal(keys[13], (2, Hd), jnp.float32)
    sentences = jax.random.randint(keys[14], (B, T), 0, vocab_size, jnp.int32)

    raw = dict(w_ih_f=w_ih_f, w_hh_f=w_hh_f, b_ih_f=b_ih_f, b_hh_f=b_hh_f,
               w_ih_r=w_ih_r, w_hh_r=w_hh_r, b_ih_r=b_ih_r, b_hh_r=b_hh_r,
               h0=h0, c0=c0, w_tag=w_tag, b_tag=b_tag, transitions=transitions)
    params = pack_params(raw, Hd)

    feats, score, path, start_reached = bilstm_crf_forward(
        sentences, emb_table, params, tag_to_ix[start_tag], tag_to_ix[end_tag])
    jax.block_until_ready((feats, score, path, start_reached))

    for b in range(B):
        # sanity 1: LSTM features vs a pure-JAX transcription of the PyTorch math
        embeds = jnp.take(emb_table, sentences[b], axis=0)
        ref_f = _ref_feats(embeds, raw)
        assert jnp.allclose(feats[b], ref_f, atol=2e-3, rtol=2e-3), "feats mismatch"

        # sanity 2: Viterbi decode vs a host reference run on the kernel's feats
        ref_score, ref_path, ref_start = _ref_viterbi(
            feats[b], transitions, tag_to_ix[start_tag], tag_to_ix[end_tag])
        assert abs(float(score[b]) - ref_score) < 1e-3, "viterbi score mismatch"
        assert [int(x) for x in np.asarray(path[b])] == ref_path, "viterbi path mismatch"
        assert int(start_reached[b]) == tag_to_ix[start_tag] == ref_start, \
            "viterbi backtrack did not reach <START>"
        assert path[b].shape == (T,)

    print("KERNEL_OK")
</pallas_src>

<mosaic_0001>
module attributes {stable_mosaic.version = 11 : i64} {
  func.func @_bilstm_crf_kernel(%arg0: i32, %arg1: memref<2x8xi32, #tpu.memory_space<smem>>, %arg2: memref<50x16xf32, #tpu.memory_space<vmem>>, %arg3: memref<16x128xf32, #tpu.memory_space<vmem>>, %arg4: memref<16x128xf32, #tpu.memory_space<vmem>>, %arg5: memref<1x128xf32, #tpu.memory_space<vmem>>, %arg6: memref<32x128xf32, #tpu.memory_space<vmem>>, %arg7: memref<1x32xf32, #tpu.memory_space<vmem>>, %arg8: memref<1x32xf32, #tpu.memory_space<vmem>>, %arg9: memref<32x128xf32, #tpu.memory_space<vmem>>, %arg10: memref<1x128xf32, #tpu.memory_space<vmem>>, %arg11: memref<5x5xf32, #tpu.memory_space<vmem>>, %arg12: memref<5x5xf32, #tpu.memory_space<vmem>>, %arg13: memref<16x128xf32, #tpu.memory_space<vmem>>, %arg14: memref<8x16xf32, #tpu.memory_space<vmem>>, %arg15: memref<8x16xf32, #tpu.memory_space<vmem>>) attributes {dimension_semantics = [#tpu.dimension_semantics<parallel>], iteration_bounds = array<i64: 2>, scalar_prefetch = 1 : i64, scratch_operands = 2 : i64, tpu.core_type = #tpu.core_type<tc>, window_params = [{pipeline_mode = #tpu.pipeline_mode<synchronous>, transform_indices = @transform_0, window_bounds = array<i64: 50, 16>}, {pipeline_mode = #tpu.pipeline_mode<synchronous>, transform_indices = @transform_1, window_bounds = array<i64: 16, 128>}, {pipeline_mode = #tpu.pipeline_mode<synchronous>, transform_indices = @transform_2, window_bounds = array<i64: 16, 128>}, {pipeline_mode = #tpu.pipeline_mode<synchronous>, transform_indices = @transform_3, window_bounds = array<i64: 1, 128>}, {pipeline_mode = #tpu.pipeline_mode<synchronous>, transform_indices = @transform_4, window_bounds = array<i64: 32, 128>}, {pipeline_mode = #tpu.pipeline_mode<synchronous>, transform_indices = @transform_5, window_bounds = array<i64: 1, 32>}, {pipeline_mode = #tpu.pipeline_mode<synchronous>, transform_indices = @transform_6, window_bounds = array<i64: 1, 32>}, {pipeline_mode = #tpu.pipeline_mode<synchronous>, transform_indices = @transform_7, window_bounds = array<i64: 32, 128>}, {pipeline_mode = #tpu.pipeline_mode<synchronous>, transform_indices = @transform_8, window_bounds = array<i64: 1, 128>}, {pipeline_mode = #tpu.pipeline_mode<synchronous>, transform_indices = @transform_9, window_bounds = array<i64: 5, 5>}, {pipeline_mode = #tpu.pipeline_mode<synchronous>, transform_indices = @transform_10, window_bounds = array<i64: 5, 5>}, {transform_indices = @transform_11, window_bounds = array<i64: 16, 128>}]} {
    %c0 = arith.constant 0 : index
    %c0_0 = arith.constant 0 : index
    %0 = vector.load %arg6[%c0, %c0_0] : memref<32x128xf32, #tpu.memory_space<vmem>>, vector<32x128xf32>
    %c0_1 = arith.constant 0 : index
    %c0_2 = arith.constant 0 : index
    %1 = vector.load %arg11[%c0_1, %c0_2] : memref<5x5xf32, #tpu.memory_space<vmem>>, vector<5x5xf32>
    %c0_3 = arith.constant 0 : index
    %c0_4 = arith.constant 0 : index
    %2 = vector.load %arg12[%c0_3, %c0_4] : memref<5x5xf32, #tpu.memory_space<vmem>>, vector<5x5xf32>
    %c0_5 = arith.constant 0 : index
    %c0_6 = arith.constant 0 : index
    %3 = vector.load %arg5[%c0_5, %c0_6] : memref<1x128xf32, #tpu.memory_space<vmem>>, vector<1x128xf32>
    %c0_7 = arith.constant 0 : index
    %c0_8 = arith.constant 0 : index
    %4 = vector.load %arg7[%c0_7, %c0_8] : memref<1x32xf32, #tpu.memory_space<vmem>>, vector<1x32xf32>
    %c0_9 = arith.constant 0 : index
    %c0_10 = arith.constant 0 : index
    %5 = vector.load %arg8[%c0_9, %c0_10] : memref<1x32xf32, #tpu.memory_space<vmem>>, vector<1x32xf32>
    %6 = tpu.iota {dimensions = array<i32: 1>} : vector<1x5xi32>
    %7 = tpu.iota {dimensions = array<i32: 0>} : vector<5x1xi32>
    %8 = tpu.iota {dimensions = array<i32: 0>} : vector<5x5xi32>
    %9 = tpu.iota {dimensions = array<i32: 1>} : vector<5x5xi32>
    %10 = tpu.iota {dimensions = array<i32: 1>} : vector<1x128xi32>
    %11 = tpu.iota {dimensions = array<i32: 0>} : vector<8x50xi32>
    %12 = tpu.iota {dimensions = array<i32: 1>} : vector<8x50xi32>
    %cst = arith.constant 0.000000e+00 : f32
    %13 = vector.broadcast %cst : f32 to vector<8x50xf32>
    %c0_i32 = arith.constant 0 : i32
    %14 = vector.broadcast %c0_i32 : i32 to vector<8x50xi32>
    %15 = arith.cmpi eq, %11, %14 : vector<8x50xi32>
    %16 = arith.index_cast %arg0 : i32 to index
    %c0_11 = arith.constant 0 : index
    %17 = memref.load %arg1[%16, %c0_11] : memref<2x8xi32, #tpu.memory_space<smem>>
    %18 = vector.broadcast %17 : i32 to vector<8x50xi32>
    %19 = arith.cmpi eq, %12, %18 : vector<8x50xi32>
    %20 = arith.andi %15, %19 : vector<8x50xi1>
    %cst_12 = arith.constant 1.000000e+00 : f32
    %21 = vector.broadcast %cst_12 : f32 to vector<8x50xf32>
    %22 = arith.select %20, %21, %13 : vector<8x50xi1>, vector<8x50xf32>
    %c1_i32 = arith.constant 1 : i32
    %23 = vector.broadcast %c1_i32 : i32 to vector<8x50xi32>
    %24 = arith.cmpi eq, %11, %23 : vector<8x50xi32>
    %25 = arith.index_cast %arg0 : i32 to index
    %c1 = arith.constant 1 : index
    %26 = memref.load %arg1[%25, %c1] : memref<2x8xi32, #tpu.memory_space<smem>>
    %27 = vector.broadcast %26 : i32 to vector<8x50xi32>
    %28 = arith.cmpi eq, %12, %27 : vector<8x50xi32>
    %29 = arith.andi %24, %28 : vector<8x50xi1>
    %cst_13 = arith.constant 1.000000e+00 : f32
    %30 = vector.broadcast %cst_13 : f32 to vector<8x50xf32>
    %31 = arith.select %29, %30, %22 : vector<8x50xi1>, vector<8x50xf32>
    %c2_i32 = arith.constant 2 : i32
    %32 = vector.broadcast %c2_i32 : i32 to vector<8x50xi32>
    %33 = arith.cmpi eq, %11, %32 : vector<8x50xi32>
    %34 = arith.index_cast %arg0 : i32 to index
    %c2 = arith.constant 2 : index
    %35 = memref.load %arg1[%34, %c2] : memref<2x8xi32, #tpu.memory_space<smem>>
    %36 = vector.broadcast %35 : i32 to vector<8x50xi32>
    %37 = arith.cmpi eq, %12, %36 : vector<8x50xi32>
    %38 = arith.andi %33, %37 : vector<8x50xi1>
    %cst_14 = arith.constant 1.000000e+00 : f32
    %39 = vector.broadcast %cst_14 : f32 to vector<8x50xf32>
    %40 = arith.select %38, %39, %31 : vector<8x50xi1>, vector<8x50xf32>
    %c3_i32 = arith.constant 3 : i32
    %41 = vector.broadcast %c3_i32 : i32 to vector<8x50xi32>
    %42 = arith.cmpi eq, %11, %41 : vector<8x50xi32>
    %43 = arith.index_cast %arg0 : i32 to index
    %c3 = arith.constant 3 : index
    %44 = memref.load %arg1[%43, %c3] : memref<2x8xi32, #tpu.memory_space<smem>>
    %45 = vector.broadcast %44 : i32 to vector<8x50xi32>
    %46 = arith.cmpi eq, %12, %45 : vector<8x50xi32>
    %47 = arith.andi %42, %46 : vector<8x50xi1>
    %cst_15 = arith.constant 1.000000e+00 : f32
    %48 = vector.broadcast %cst_15 : f32 to vector<8x50xf32>
    %49 = arith.select %47, %48, %40 : vector<8x50xi1>, vector<8x50xf32>
    %c4_i32 = arith.constant 4 : i32
    %50 = vector.broadcast %c4_i32 : i32 to vector<8x50xi32>
    %51 = arith.cmpi eq, %11, %50 : vector<8x50xi32>
    %52 = arith.index_cast %arg0 : i32 to index
    %c4 = arith.constant 4 : index
    %53 = memref.load %arg1[%52, %c4] : memref<2x8xi32, #tpu.memory_space<smem>>
    %54 = vector.broadcast %53 : i32 to vector<8x50xi32>
    %55 = arith.cmpi eq, %12, %54 : vector<8x50xi32>
    %56 = arith.andi %51, %55 : vector<8x50xi1>
    %cst_16 = arith.constant 1.000000e+00 : f32
    %57 = vector.broadcast %cst_16 : f32 to vector<8x50xf32>
    %58 = arith.select %56, %57, %49 : vector<8x50xi1>, vector<8x50xf32>
    %c5_i32 = arith.constant 5 : i32
    %59 = vector.broadcast %c5_i32 : i32 to vector<8x50xi32>
    %60 = arith.cmpi eq, %11, %59 : vector<8x50xi32>
    %61 = arith.index_cast %arg0 : i32 to index
    %c5 = arith.constant 5 : index
    %62 = memref.load %arg1[%61, %c5] : memref<2x8xi32, #tpu.memory_space<smem>>
    %63 = vector.broadcast %62 : i32 to vector<8x50xi32>
    %64 = arith.cmpi eq, %12, %63 : vector<8x50xi32>
    %65 = arith.andi %60, %64 : vector<8x50xi1>
    %cst_17 = arith.constant 1.000000e+00 : f32
    %66 = vector.broadcast %cst_17 : f32 to vector<8x50xf32>
    %67 = arith.select %65, %66, %58 : vector<8x50xi1>, vector<8x50xf32>
    %c6_i32 = arith.constant 6 : i32
    %68 = vector.broadcast %c6_i32 : i32 to vector<8x50xi32>
    %69 = arith.cmpi eq, %11, %68 : vector<8x50xi32>
    %70 = arith.index_cast %arg0 : i32 to index
    %c6 = arith.constant 6 : index
    %71 = memref.load %arg1[%70, %c6] : memref<2x8xi32, #tpu.memory_space<smem>>
    %72 = vector.broadcast %71 : i32 to vector<8x50xi32>
    %73 = arith.cmpi eq, %12, %72 : vector<8x50xi32>
    %74 = arith.andi %69, %73 : vector<8x50xi1>
    %cst_18 = arith.constant 1.000000e+00 : f32
    %75 = vector.broadcast %cst_18 : f32 to vector<8x50xf32>
    %76 = arith.select %74, %75, %67 : vector<8x50xi1>, vector<8x50xf32>
    %c7_i32 = arith.constant 7 : i32
    %77 = vector.broadcast %c7_i32 : i32 to vector<8x50xi32>
    %78 = arith.cmpi eq, %11, %77 : vector<8x50xi32>
    %79 = arith.index_cast %arg0 : i32 to index
    %c7 = arith.constant 7 : index
    %80 = memref.load %arg1[%79, %c7] : memref<2x8xi32, #tpu.memory_space<smem>>
    %81 = vector.broadcast %80 : i32 to vector<8x50xi32>
    %82 = arith.cmpi eq, %12, %81 : vector<8x50xi32>
    %83 = arith.andi %78, %82 : vector<8x50xi1>
    %cst_19 = arith.constant 1.000000e+00 : f32
    %84 = vector.broadcast %cst_19 : f32 to vector<8x50xf32>
    %85 = arith.select %83, %84, %76 : vector<8x50xi1>, vector<8x50xf32>
    %c0_20 = arith.constant 0 : index
    %c0_21 = arith.constant 0 : index
    %86 = vector.load %arg2[%c0_20, %c0_21] : memref<50x16xf32, #tpu.memory_space<vmem>>, vector<50x16xf32>
    %cst_22 = arith.constant dense<0.000000e+00> : vector<8x16xf32>
    %87 = tpu.matmul %85, %86, %cst_22 {dimension_numbers = #tpu.dot_dimension_numbers<[1], [0], [0], [1], [0, 0, 1, 1], [], []>} : vector<8x50xf32>, vector<50x16xf32>, vector<8x16xf32> -> vector<8x16xf32>
    %c0_23 = arith.constant 0 : index
    %c0_24 = arith.constant 0 : index
    %88 = vector.load %arg3[%c0_23, %c0_24] : memref<16x128xf32, #tpu.memory_space<vmem>>, vector<16x128xf32>
    %cst_25 = arith.constant dense<0.000000e+00> : vector<8x128xf32>
    %89 = tpu.matmul %87, %88, %cst_25 {dimension_numbers = #tpu.dot_dimension_numbers<[1], [0], [0], [1], [0, 0, 1, 1], [], []>} : vector<8x16xf32>, vector<16x128xf32>, vector<8x128xf32> -> vector<8x128xf32>
    %90 = vector.broadcast %3 : vector<1x128xf32> to vector<8x128xf32>
    %91 = arith.addf %89, %90 : vector<8x128xf32>
    %c0_26 = arith.constant 0 : index
    %c0_27 = arith.constant 0 : index
    %92 = vector.load %arg4[%c0_26, %c0_27] : memref<16x128xf32, #tpu.memory_space<vmem>>, vector<16x128xf32>
    %cst_28 = arith.constant dense<0.000000e+00> : vector<8x128xf32>
    %93 = tpu.matmul %87, %92, %cst_28 {dimension_numbers = #tpu.dot_dimension_numbers<[1], [0], [0], [1], [0, 0, 1, 1], [], []>} : vector<8x16xf32>, vector<16x128xf32>, vector<8x128xf32> -> vector<8x128xf32>
    %94 = vector.extract_strided_slice %91 {offsets = [0, 0], sizes = [1, 128], strides = [1, 1]} : vector<8x128xf32> to vector<1x128xf32>
    %95 = vector.extract_strided_slice %93 {offsets = [7, 0], sizes = [1, 128], strides = [1, 1]} : vector<8x128xf32> to vector<1x128xf32>
    %96 = arith.addf %94, %95 : vector<1x128xf32>
    %cst_29 = arith.constant dense<0.000000e+00> : vector<1x128xf32>
    %97 = tpu.matmul %4, %0, %cst_29 {dimension_numbers = #tpu.dot_dimension_numbers<[1], [0], [0], [1], [0, 0, 1, 1], [], []>} : vector<1x32xf32>, vector<32x128xf32>, vector<1x128xf32> -> vector<1x128xf32>
    %98 = arith.addf %96, %97 : vector<1x128xf32>
    %99 = arith.negf %98 : vector<1x128xf32>
    %100 = math.exp %99 : vector<1x128xf32>
    %cst_30 = arith.constant 1.000000e+00 : f32
    %101 = vector.broadcast %cst_30 : f32 to vector<1x128xf32>
    %102 = arith.addf %101, %100 : vector<1x128xf32>
    %103 = arith.divf %101, %102 : vector<1x128xf32>
    %104 = vector.extract_strided_slice %103 {offsets = [0, 0], sizes = [1, 32], strides = [1, 1]} : vector<1x128xf32> to vector<1x32xf32>
    %105 = vector.extract_strided_slice %103 {offsets = [0, 32], sizes = [1, 32], strides = [1, 1]} : vector<1x128xf32> to vector<1x32xf32>
    %106 = vector.extract_strided_slice %103 {offsets = [0, 64], sizes = [1, 32], strides = [1, 1]} : vector<1x128xf32> to vector<1x32xf32>
    %cst_31 = arith.constant 2.000000e+00 : f32
    %107 = vector.broadcast %cst_31 : f32 to vector<1x32xf32>
    %108 = arith.mulf %107, %106 : vector<1x32xf32>
    %cst_32 = arith.constant 1.000000e+00 : f32
    %109 = vector.broadcast %cst_32 : f32 to vector<1x32xf32>
    %110 = arith.subf %108, %109 : vector<1x32xf32>
    %111 = vector.extract_strided_slice %103 {offsets = [0, 96], sizes = [1, 32], strides = [1, 1]} : vector<1x128xf32> to vector<1x32xf32>
    %112 = arith.mulf %105, %5 : vector<1x32xf32>
    %113 = arith.mulf %104, %110 : vector<1x32xf32>
    %114 = arith.addf %112, %113 : vector<1x32xf32>
    %115 = math.tanh %114 : vector<1x32xf32>
    %116 = arith.mulf %111, %115 : vector<1x32xf32>
    %117 = vector.extract_strided_slice %116 {offsets = [0, 0], sizes = [1, 16], strides = [1, 1]} : vector<1x32xf32> to vector<1x16xf32>
    %c0_33 = arith.constant 0 : index
    %c0_34 = arith.constant 0 : index
    %118 = vector.load %arg14[%c0_33, %c0_34] : memref<8x16xf32, #tpu.memory_space<vmem>>, vector<1x16xf32>
    tpu.vector_store %arg14[%c0_33, %c0_34], %117 {strides = array<i32>} : memref<8x16xf32, #tpu.memory_space<vmem>>, vector<1x16xf32>,
    %119 = vector.extract_strided_slice %116 {offsets = [0, 16], sizes = [1, 16], strides = [1, 1]} : vector<1x32xf32> to vector<1x16xf32>
    %c7_35 = arith.constant 7 : index
    %c0_36 = arith.constant 0 : index
    %120 = vector.load %arg15[%c7_35, %c0_36] : memref<8x16xf32, #tpu.memory_space<vmem>>, vector<1x16xf32>
    tpu.vector_store %arg15[%c7_35, %c0_36], %119 {strides = array<i32>} : memref<8x16xf32, #tpu.memory_space<vmem>>, vector<1x16xf32>,
    %121 = vector.extract_strided_slice %91 {offsets = [1, 0], sizes = [1, 128], strides = [1, 1]} : vector<8x128xf32> to vector<1x128xf32>
    %122 = vector.extract_strided_slice %93 {offsets = [6, 0], sizes = [1, 128], strides = [1, 1]} : vector<8x128xf32> to vector<1x128xf32>
    %123 = arith.addf %121, %122 : vector<1x128xf32>
    %cst_37 = arith.constant dense<0.000000e+00> : vector<1x128xf32>
    %124 = tpu.matmul %116, %0, %cst_37 {dimension_numbers = #tpu.dot_dimension_numbers<[1], [0], [0], [1], [0, 0, 1, 1], [], []>} : vector<1x32xf32>, vector<32x128xf32>, vector<1x128xf32> -> vector<1x128xf32>
    %125 = arith.addf %123, %124 : vector<1x128xf32>
    %126 = arith.negf %125 : vector<1x128xf32>
    %127 = math.exp %126 : vector<1x128xf32>
    %cst_38 = arith.constant 1.000000e+00 : f32
    %128 = vector.broadcast %cst_38 : f32 to vector<1x128xf32>
    %129 = arith.addf %128, %127 : vector<1x128xf32>
    %130 = arith.divf %128, %129 : vector<1x128xf32>
    %131 = vector.extract_strided_slice %130 {offsets = [0, 0], sizes = [1, 32], strides = [1, 1]} : vector<1x128xf32> to vector<1x32xf32>
    %132 = vector.extract_strided_slice %130 {offsets = [0, 32], sizes = [1, 32], strides = [1, 1]} : vector<1x128xf32> to vector<1x32xf32>
    %133 = vector.extract_strided_slice %130 {offsets = [0, 64], sizes = [1, 32], strides = [1, 1]} : vector<1x128xf32> to vector<1x32xf32>
    %cst_39 = arith.constant 2.000000e+00 : f32
    %134 = vector.broadcast %cst_39 : f32 to vector<1x32xf32>
    %135 = arith.mulf %134, %133 : vector<1x32xf32>
    %cst_40 = arith.constant 1.000000e+00 : f32
    %136 = vector.broadcast %cst_40 : f32 to vector<1x32xf32>
    %137 = arith.subf %135, %136 : vector<1x32xf32>
    %138 = vector.extract_strided_slice %130 {offsets = [0, 96], sizes = [1, 32], strides = [1, 1]} : vector<1x128xf32> to vector<1x32xf32>
    %139 = arith.mulf %132, %114 : vector<1x32xf32>
    %140 = arith.mulf %131, %137 : vector<1x32xf32>
    %141 = arith.addf %139, %140 : vector<1x32xf32>
    %142 = math.tanh %141 : vector<1x32xf32>
    %143 = arith.mulf %138, %142 : vector<1x32xf32>
    %144 = vector.extract_strided_slice %143 {offsets = [0, 0], sizes = [1, 16], strides = [1, 1]} : vector<1x32xf32> to vector<1x16xf32>
    %c1_41 = arith.constant 1 : index
    %c0_42 = arith.constant 0 : index
    %145 = vector.load %arg14[%c1_41, %c0_42] : memref<8x16xf32, #tpu.memory_space<vmem>>, vector<1x16xf32>
    tpu.vector_store %arg14[%c1_41, %c0_42], %144 {strides = array<i32>} : memref<8x16xf32, #tpu.memory_space<vmem>>, vector<1x16xf32>,
    %146 = vector.extract_strided_slice %143 {offsets = [0, 16], sizes = [1, 16], strides = [1, 1]} : vector<1x32xf32> to vector<1x16xf32>
    %c6_43 = arith.constant 6 : index
    %c0_44 = arith.constant 0 : index
    %147 = vector.load %arg15[%c6_43, %c0_44] : memref<8x16xf32, #tpu.memory_space<vmem>>, vector<1x16xf32>
    tpu.vector_store %arg15[%c6_43, %c0_44], %146 {strides = array<i32>} : memref<8x16xf32, #tpu.memory_space<vmem>>, vector<1x16xf32>,
    %148 = vector.extract_strided_slice %91 {offsets = [2, 0], sizes = [1, 128], strides = [1, 1]} : vector<8x128xf32> to vector<1x128xf32>
    %149 = vector.extract_strided_slice %93 {offsets = [5, 0], sizes = [1, 128], strides = [1, 1]} : vector<8x128xf32> to vector<1x128xf32>
    %150 = arith.addf %148, %149 : vector<1x128xf32>
    %cst_45 = arith.constant dense<0.000000e+00> : vector<1x128xf32>
    %151 = tpu.matmul %143, %0, %cst_45 {dimension_numbers = #tpu.dot_dimension_numbers<[1], [0], [0], [1], [0, 0, 1, 1], [], []>} : vector<1x32xf32>, vector<32x128xf32>, vector<1x128xf32> -> vector<1x128xf32>
    %152 = arith.addf %150, %151 : vector<1x128xf32>
    %153 = arith.negf %152 : vector<1x128xf32>
    %154 = math.exp %153 : vector<1x128xf32>
    %cst_46 = arith.constant 1.000000e+00 : f32
    %155 = vector.broadcast %cst_46 : f32 to vector<1x128xf32>
    %156 = arith.addf %155, %154 : vector<1x128xf32>
    %157 = arith.divf %155, %156 : vector<1x128xf32>
    %158 = vector.extract_strided_slice %157 {offsets = [0, 0], sizes = [1, 32], strides = [1, 1]} : vector<1x128xf32> to vector<1x32xf32>
    %159 = vector.extract_strided_slice %157 {offsets = [0, 32], sizes = [1, 32], strides = [1, 1]} : vector<1x128xf32> to vector<1x32xf32>
    %160 = vector.extract_strided_slice %157 {offsets = [0, 64], sizes = [1, 32], strides = [1, 1]} : vector<1x128xf32> to vector<1x32xf32>
    %cst_47 = arith.constant 2.000000e+00 : f32
    %161 = vector.broadcast %cst_47 : f32 to vector<1x32xf32>
    %162 = arith.mulf %161, %160 : vector<1x32xf32>
    %cst_48 = arith.constant 1.000000e+00 : f32
    %163 = vector.broadcast %cst_48 : f32 to vector<1x32xf32>
    %164 = arith.subf %162, %163 : vector<1x32xf32>
    %165 = vector.extract_strided_slice %157 {offsets = [0, 96], sizes = [1, 32], strides = [1, 1]} : vector<1x128xf32> to vector<1x32xf32>
    %166 = arith.mulf %159, %141 : vector<1x32xf32>
    %167 = arith.mulf %158, %164 : vector<1x32xf32>
    %168 = arith.addf %166, %167 : vector<1x32xf32>
    %169 = math.tanh %168 : vector<1x32xf32>
    %170 = arith.mulf %165, %169 : vector<1x32xf32>
    %171 = vector.extract_strided_slice %170 {offsets = [0, 0], sizes = [1, 16], strides = [1, 1]} : vector<1x32xf32> to vector<1x16xf32>
    %c2_49 = arith.constant 2 : index
    %c0_50 = arith.constant 0 : index
    %172 = vector.load %arg14[%c2_49, %c0_50] : memref<8x16xf32, #tpu.memory_space<vmem>>, vector<1x16xf32>
    tpu.vector_store %arg14[%c2_49, %c0_50], %171 {strides = array<i32>} : memref<8x16xf32, #tpu.memory_space<vmem>>, vector<1x16xf32>,
    %173 = vector.extract_strided_slice %170 {offsets = [0, 16], sizes = [1, 16], strides = [1, 1]} : vector<1x32xf32> to vector<1x16xf32>
    %c5_51 = arith.constant 5 : index
    %c0_52 = arith.constant 0 : index
    %174 = vector.load %arg15[%c5_51, %c0_52] : memref<8x16xf32, #tpu.memory_space<vmem>>, vector<1x16xf32>
    tpu.vector_store %arg15[%c5_51, %c0_52], %173 {strides = array<i32>} : memref<8x16xf32, #tpu.memory_space<vmem>>, vector<1x16xf32>,
    %175 = vector.extract_strided_slice %91 {offsets = [3, 0], sizes = [1, 128], strides = [1, 1]} : vector<8x128xf32> to vector<1x128xf32>
    %176 = vector.extract_strided_slice %93 {offsets = [4, 0], sizes = [1, 128], strides = [1, 1]} : vector<8x128xf32> to vector<1x128xf32>
    %177 = arith.addf %175, %176 : vector<1x128xf32>
    %cst_53 = arith.constant dense<0.000000e+00> : vector<1x128xf32>
    %178 = tpu.matmul %170, %0, %cst_53 {dimension_numbers = #tpu.dot_dimension_numbers<[1], [0], [0], [1], [0, 0, 1, 1], [], []>} : vector<1x32xf32>, vector<32x128xf32>, vector<1x128xf32> -> vector<1x128xf32>
    %179 = arith.addf %177, %178 : vector<1x128xf32>
    %180 = arith.negf %179 : vector<1x128xf32>
    %181 = math.exp %180 : vector<1x128xf32>
    %cst_54 = arith.constant 1.000000e+00 : f32
    %182 = vector.broadcast %cst_54 : f32 to vector<1x128xf32>
    %183 = arith.addf %182, %181 : vector<1x128xf32>
    %184 = arith.divf %182, %183 : vector<1x128xf32>
    %185 = vector.extract_strided_slice %184 {offsets = [0, 0], sizes = [1, 32], strides = [1, 1]} : vector<1x128xf32> to vector<1x32xf32>
    %186 = vector.extract_strided_slice %184 {offsets = [0, 32], sizes = [1, 32], strides = [1, 1]} : vector<1x128xf32> to vector<1x32xf32>
    %187 = vector.extract_strided_slice %184 {offsets = [0, 64], sizes = [1, 32], strides = [1, 1]} : vector<1x128xf32> to vector<1x32xf32>
    %cst_55 = arith.constant 2.000000e+00 : f32
    %188 = vector.broadcast %cst_55 : f32 to vector<1x32xf32>
    %189 = arith.mulf %188, %187 : vector<1x32xf32>
    %cst_56 = arith.constant 1.000000e+00 : f32
    %190 = vector.broadcast %cst_56 : f32 to vector<1x32xf32>
    %191 = arith.subf %189, %190 : vector<1x32xf32>
    %192 = vector.extract_strided_slice %184 {offsets = [0, 96], sizes = [1, 32], strides = [1, 1]} : vector<1x128xf32> to vector<1x32xf32>
    %193 = arith.mulf %186, %168 : vector<1x32xf32>
    %194 = arith.mulf %185, %191 : vector<1x32xf32>
    %195 = arith.addf %193, %194 : vector<1x32xf32>
    %196 = math.tanh %195 : vector<1x32xf32>
    %197 = arith.mulf %192, %196 : vector<1x32xf32>
    %198 = vector.extract_strided_slice %197 {offsets = [0, 0], sizes = [1, 16], strides = [1, 1]} : vector<1x32xf32> to vector<1x16xf32>
    %c3_57 = arith.constant 3 : index
    %c0_58 = arith.constant 0 : index
    %199 = vector.load %arg14[%c3_57, %c0_58] : memref<8x16xf32, #tpu.memory_space<vmem>>, vector<1x16xf32>
    tpu.vector_store %arg14[%c3_57, %c0_58], %198 {strides = array<i32>} : memref<8x16xf32, #tpu.memory_space<vmem>>, vector<1x16xf32>,
    %200 = vector.extract_strided_slice %197 {offsets = [0, 16], sizes = [1, 16], strides = [1, 1]} : vector<1x32xf32> to vector<1x16xf32>
    %c4_59 = arith.constant 4 : index
    %c0_60 = arith.constant 0 : index
    %201 = vector.load %arg15[%c4_59, %c0_60] : memref<8x16xf32, #tpu.memory_space<vmem>>, vector<1x16xf32>
    tpu.vector_store %arg15[%c4_59, %c0_60], %200 {strides = array<i32>} : memref<8x16xf32, #tpu.memory_space<vmem>>, vector<1x16xf32>,
    %202 = vector.extract_strided_slice %91 {offsets = [4, 0], sizes = [1, 128], strides = [1, 1]} : vector<8x128xf32> to vector<1x128xf32>
    %203 = vector.extract_strided_slice %93 {offsets = [3, 0], sizes = [1, 128], strides = [1, 1]} : vector<8x128xf32> to vector<1x128xf32>
    %204 = arith.addf %202, %203 : vector<1x128xf32>
    %cst_61 = arith.constant dense<0.000000e+00> : vector<1x128xf32>
    %205 = tpu.matmul %197, %0, %cst_61 {dimension_numbers = #tpu.dot_dimension_numbers<[1], [0], [0], [1], [0, 0, 1, 1], [], []>} : vector<1x32xf32>, vector<32x128xf32>, vector<1x128xf32> -> vector<1x128xf32>
    %206 = arith.addf %204, %205 : vector<1x128xf32>
    %207 = arith.negf %206 : vector<1x128xf32>
    %208 = math.exp %207 : vector<1x128xf32>
    %cst_62 = arith.constant 1.000000e+00 : f32
    %209 = vector.broadcast %cst_62 : f32 to vector<1x128xf32>
    %210 = arith.addf %209, %208 : vector<1x128xf32>
    %211 = arith.divf %209, %210 : vector<1x128xf32>
    %212 = vector.extract_strided_slice %211 {offsets = [0, 0], sizes = [1, 32], strides = [1, 1]} : vector<1x128xf32> to vector<1x32xf32>
    %213 = vector.extract_strided_slice %211 {offsets = [0, 32], sizes = [1, 32], strides = [1, 1]} : vector<1x128xf32> to vector<1x32xf32>
    %214 = vector.extract_strided_slice %211 {offsets = [0, 64], sizes = [1, 32], strides = [1, 1]} : vector<1x128xf32> to vector<1x32xf32>
    %cst_63 = arith.constant 2.000000e+00 : f32
    %215 = vector.broadcast %cst_63 : f32 to vector<1x32xf32>
    %216 = arith.mulf %215, %214 : vector<1x32xf32>
    %cst_64 = arith.constant 1.000000e+00 : f32
    %217 = vector.broadcast %cst_64 : f32 to vector<1x32xf32>
    %218 = arith.subf %216, %217 : vector<1x32xf32>
    %219 = vector.extract_strided_slice %211 {offsets = [0, 96], sizes = [1, 32], strides = [1, 1]} : vector<1x128xf32> to vector<1x32xf32>
    %220 = arith.mulf %213, %195 : vector<1x32xf32>
    %221 = arith.mulf %212, %218 : vector<1x32xf32>
    %222 = arith.addf %220, %221 : vector<1x32xf32>
    %223 = math.tanh %222 : vector<1x32xf32>
    %224 = arith.mulf %219, %223 : vector<1x32xf32>
    %225 = vector.extract_strided_slice %224 {offsets = [0, 0], sizes = [1, 16], strides = [1, 1]} : vector<1x32xf32> to vector<1x16xf32>
    %c4_65 = arith.constant 4 : index
    %c0_66 = arith.constant 0 : index
    %226 = vector.load %arg14[%c4_65, %c0_66] : memref<8x16xf32, #tpu.memory_space<vmem>>, vector<1x16xf32>
    tpu.vector_store %arg14[%c4_65, %c0_66], %225 {strides = array<i32>} : memref<8x16xf32, #tpu.memory_space<vmem>>, vector<1x16xf32>,
    %227 = vector.extract_strided_slice %224 {offsets = [0, 16], sizes = [1, 16], strides = [1, 1]} : vector<1x32xf32> to vector<1x16xf32>
    %c3_67 = arith.constant 3 : index
    %c0_68 = arith.constant 0 : index
    %228 = vector.load %arg15[%c3_67, %c0_68] : memref<8x16xf32, #tpu.memory_space<vmem>>, vector<1x16xf32>
    tpu.vector_store %arg15[%c3_67, %c0_68], %227 {strides = array<i32>} : memref<8x16xf32, #tpu.memory_space<vmem>>, vector<1x16xf32>,
    %229 = vector.extract_strided_slice %91 {offsets = [5, 0], sizes = [1, 128], strides = [1, 1]} : vector<8x128xf32> to vector<1x128xf32>
    %230 = vector.extract_strided_slice %93 {offsets = [2, 0], sizes = [1, 128], strides = [1, 1]} : vector<8x128xf32> to vector<1x128xf32>
    %231 = arith.addf %229, %230 : vector<1x128xf32>
    %cst_69 = arith.constant dense<0.000000e+00> : vector<1x128xf32>
    %232 = tpu.matmul %224, %0, %cst_69 {dimension_numbers = #tpu.dot_dimension_numbers<[1], [0], [0], [1], [0, 0, 1, 1], [], []>} : vector<1x32xf32>, vector<32x128xf32>, vector<1x128xf32> -> vector<1x128xf32>
    %233 = arith.addf %231, %232 : vector<1x128xf32>
    %234 = arith.negf %233 : vector<1x128xf32>
    %235 = math.exp %234 : vector<1x128xf32>
    %cst_70 = arith.constant 1.000000e+00 : f32
    %236 = vector.broadcast %cst_70 : f32 to vector<1x128xf32>
    %237 = arith.addf %236, %235 : vector<1x128xf32>
    %238 = arith.divf %236, %237 : vector<1x128xf32>
    %239 = vector.extract_strided_slice %238 {offsets = [0, 0], sizes = [1, 32], strides = [1, 1]} : vector<1x128xf32> to vector<1x32xf32>
    %240 = vector.extract_strided_slice %238 {offsets = [0, 32], sizes = [1, 32], strides = [1, 1]} : vector<1x128xf32> to vector<1x32xf32>
    %241 = vector.extract_strided_slice %238 {offsets = [0, 64], sizes = [1, 32], strides = [1, 1]} : vector<1x128xf32> to vector<1x32xf32>
    %cst_71 = arith.constant 2.000000e+00 : f32
    %242 = vector.broadcast %cst_71 : f32 to vector<1x32xf32>
    %243 = arith.mulf %242, %241 : vector<1x32xf32>
    %cst_72 = arith.constant 1.000000e+00 : f32
    %244 = vector.broadcast %cst_72 : f32 to vector<1x32xf32>
    %245 = arith.subf %243, %244 : vector<1x32xf32>
    %246 = vector.extract_strided_slice %238 {offsets = [0, 96], sizes = [1, 32], strides = [1, 1]} : vector<1x128xf32> to vector<1x32xf32>
    %247 = arith.mulf %240, %222 : vector<1x32xf32>
    %248 = arith.mulf %239, %245 : vector<1x32xf32>
    %249 = arith.addf %247, %248 : vector<1x32xf32>
    %250 = math.tanh %249 : vector<1x32xf32>
    %251 = arith.mulf %246, %250 : vector<1x32xf32>
    %252 = vector.extract_strided_slice %251 {offsets = [0, 0], sizes = [1, 16], strides = [1, 1]} : vector<1x32xf32> to vector<1x16xf32>
    %c5_73 = arith.constant 5 : index
    %c0_74 = arith.constant 0 : index
    %253 = vector.load %arg14[%c5_73, %c0_74] : memref<8x16xf32, #tpu.memory_space<vmem>>, vector<1x16xf32>
    tpu.vector_store %arg14[%c5_73, %c0_74], %252 {strides = array<i32>} : memref<8x16xf32, #tpu.memory_space<vmem>>, vector<1x16xf32>,
    %254 = vector.extract_strided_slice %251 {offsets = [0, 16], sizes = [1, 16], strides = [1, 1]} : vector<1x32xf32> to vector<1x16xf32>
    %c2_75 = arith.constant 2 : index
    %c0_76 = arith.constant 0 : index
    %255 = vector.load %arg15[%c2_75, %c0_76] : memref<8x16xf32, #tpu.memory_space<vmem>>, vector<1x16xf32>
    tpu.vector_store %arg15[%c2_75, %c0_76], %254 {strides = array<i32>} : memref<8x16xf32, #tpu.memory_space<vmem>>, vector<1x16xf32>,
    %256 = vector.extract_strided_slice %91 {offsets = [6, 0], sizes = [1, 128], strides = [1, 1]} : vector<8x128xf32> to vector<1x128xf32>
    %257 = vector.extract_strided_slice %93 {offsets = [1, 0], sizes = [1, 128], strides = [1, 1]} : vector<8x128xf32> to vector<1x128xf32>
    %258 = arith.addf %256, %257 : vector<1x128xf32>
    %cst_77 = arith.constant dense<0.000000e+00> : vector<1x128xf32>
    %259 = tpu.matmul %251, %0, %cst_77 {dimension_numbers = #tpu.dot_dimension_numbers<[1], [0], [0], [1], [0, 0, 1, 1], [], []>} : vector<1x32xf32>, vector<32x128xf32>, vector<1x128xf32> -> vector<1x128xf32>
    %260 = arith.addf %258, %259 : vector<1x128xf32>
    %261 = arith.negf %260 : vector<1x128xf32>
    %262 = math.exp %261 : vector<1x128xf32>
    %cst_78 = arith.constant 1.000000e+00 : f32
    %263 = vector.broadcast %cst_78 : f32 to vector<1x128xf32>
    %264 = arith.addf %263, %262 : vector<1x128xf32>
    %265 = arith.divf %263, %264 : vector<1x128xf32>
    %266 = vector.extract_strided_slice %265 {offsets = [0, 0], sizes = [1, 32], strides = [1, 1]} : vector<1x128xf32> to vector<1x32xf32>
    %267 = vector.extract_strided_slice %265 {offsets = [0, 32], sizes = [1, 32], strides = [1, 1]} : vector<1x128xf32> to vector<1x32xf32>
    %268 = vector.extract_strided_slice %265 {offsets = [0, 64], sizes = [1, 32], strides = [1, 1]} : vector<1x128xf32> to vector<1x32xf32>
    %cst_79 = arith.constant 2.000000e+00 : f32
    %269 = vector.broadcast %cst_79 : f32 to vector<1x32xf32>
    %270 = arith.mulf %269, %268 : vector<1x32xf32>
    %cst_80 = arith.constant 1.000000e+00 : f32
    %271 = vector.broadcast %cst_80 : f32 to vector<1x32xf32>
    %272 = arith.subf %270, %271 : vector<1x32xf32>
    %273 = vector.extract_strided_slice %265 {offsets = [0, 96], sizes = [1, 32], strides = [1, 1]} : vector<1x128xf32> to vector<1x32xf32>
    %274 = arith.mulf %267, %249 : vector<1x32xf32>
    %275 = arith.mulf %266, %272 : vector<1x32xf32>
    %276 = arith.addf %274, %275 : vector<1x32xf32>
    %277 = math.tanh %276 : vector<1x32xf32>
    %278 = arith.mulf %273, %277 : vector<1x32xf32>
    %279 = vector.extract_strided_slice %278 {offsets = [0, 0], sizes = [1, 16], strides = [1, 1]} : vector<1x32xf32> to vector<1x16xf32>
    %c6_81 = arith.constant 6 : index
    %c0_82 = arith.constant 0 : index
    %280 = vector.load %arg14[%c6_81, %c0_82] : memref<8x16xf32, #tpu.memory_space<vmem>>, vector<1x16xf32>
    tpu.vector_store %arg14[%c6_81, %c0_82], %279 {strides = array<i32>} : memref<8x16xf32, #tpu.memory_space<vmem>>, vector<1x16xf32>,
    %281 = vector.extract_strided_slice %278 {offsets = [0, 16], sizes = [1, 16], strides = [1, 1]} : vector<1x32xf32> to vector<1x16xf32>
    %c1_83 = arith.constant 1 : index
    %c0_84 = arith.constant 0 : index
    %282 = vector.load %arg15[%c1_83, %c0_84] : memref<8x16xf32, #tpu.memory_space<vmem>>, vector<1x16xf32>
    tpu.vector_store %arg15[%c1_83, %c0_84], %281 {strides = array<i32>} : memref<8x16xf32, #tpu.memory_space<vmem>>, vector<1x16xf32>,
    %283 = vector.extract_strided_slice %91 {offsets = [7, 0], sizes = [1, 128], strides = [1, 1]} : vector<8x128xf32> to vector<1x128xf32>
    %284 = vector.extract_strided_slice %93 {offsets = [0, 0], sizes = [1, 128], strides = [1, 1]} : vector<8x128xf32> to vector<1x128xf32>
    %285 = arith.addf %283, %284 : vector<1x128xf32>
    %cst_85 = arith.constant dense<0.000000e+00> : vector<1x128xf32>
    %286 = tpu.matmul %278, %0, %cst_85 {dimension_numbers = #tpu.dot_dimension_numbers<[1], [0], [0], [1], [0, 0, 1, 1], [], []>} : vector<1x32xf32>, vector<32x128xf32>, vector<1x128xf32> -> vector<1x128xf32>
    %287 = arith.addf %285, %286 : vector<1x128xf32>
    %288 = arith.negf %287 : vector<1x128xf32>
    %289 = math.exp %288 : vector<1x128xf32>
    %cst_86 = arith.constant 1.000000e+00 : f32
    %290 = vector.broadcast %cst_86 : f32 to vector<1x128xf32>
    %291 = arith.addf %290, %289 : vector<1x128xf32>
    %292 = arith.divf %290, %291 : vector<1x128xf32>
    %293 = vector.extract_strided_slice %292 {offsets = [0, 0], sizes = [1, 32], strides = [1, 1]} : vector<1x128xf32> to vector<1x32xf32>
    %294 = vector.extract_strided_slice %292 {offsets = [0, 32], sizes = [1, 32], strides = [1, 1]} : vector<1x128xf32> to vector<1x32xf32>
    %295 = vector.extract_strided_slice %292 {offsets = [0, 64], sizes = [1, 32], strides = [1, 1]} : vector<1x128xf32> to vector<1x32xf32>
    %cst_87 = arith.constant 2.000000e+00 : f32
    %296 = vector.broadcast %cst_87 : f32 to vector<1x32xf32>
    %297 = arith.mulf %296, %295 : vector<1x32xf32>
    %cst_88 = arith.constant 1.000000e+00 : f32
    %298 = vector.broadcast %cst_88 : f32 to vector<1x32xf32>
    %299 = arith.subf %297, %298 : vector<1x32xf32>
    %300 = vector.extract_strided_slice %292 {offsets = [0, 96], sizes = [1, 32], strides = [1, 1]} : vector<1x128xf32> to vector<1x32xf32>
    %301 = arith.mulf %294, %276 : vector<1x32xf32>
    %302 = arith.mulf %293, %299 : vector<1x32xf32>
    %303 = arith.addf %301, %302 : vector<1x32xf32>
    %304 = math.tanh %303 : vector<1x32xf32>
    %305 = arith.mulf %300, %304 : vector<1x32xf32>
    %306 = vector.extract_strided_slice %305 {offsets = [0, 0], sizes = [1, 16], strides = [1, 1]} : vector<1x32xf32> to vector<1x16xf32>
    %c7_89 = arith.constant 7 : index
    %c0_90 = arith.constant 0 : index
    %307 = vector.load %arg14[%c7_89, %c0_90] : memref<8x16xf32, #tpu.memory_space<vmem>>, vector<1x16xf32>
    tpu.vector_store %arg14[%c7_89, %c0_90], %306 {strides = array<i32>} : memref<8x16xf32, #tpu.memory_space<vmem>>, vector<1x16xf32>,
    %308 = vector.extract_strided_slice %305 {offsets = [0, 16], sizes = [1, 16], strides = [1, 1]} : vector<1x32xf32> to vector<1x16xf32>
    %c0_91 = arith.constant 0 : index
    %c0_92 = arith.constant 0 : index
    %309 = vector.load %arg15[%c0_91, %c0_92] : memref<8x16xf32, #tpu.memory_space<vmem>>, vector<1x16xf32>
    tpu.vector_store %arg15[%c0_91, %c0_92], %308 {strides = array<i32>} : memref<8x16xf32, #tpu.memory_space<vmem>>, vector<1x16xf32>,
    %c0_93 = arith.constant 0 : index
    %c0_94 = arith.constant 0 : index
    %310 = vector.load %arg14[%c0_93, %c0_94] : memref<8x16xf32, #tpu.memory_space<vmem>>, vector<8x16xf32>
    %c0_95 = arith.constant 0 : index
    %c0_96 = arith.constant 0 : index
    %311 = vector.load %arg9[%c0_95, %c0_96] : memref<32x128xf32, #tpu.memory_space<vmem>>, vector<16x128xf32>
    %cst_97 = arith.constant dense<0.000000e+00> : vector<8x128xf32>
    %312 = tpu.matmul %310, %311, %cst_97 {dimension_numbers = #tpu.dot_dimension_numbers<[1], [0], [0], [1], [0, 0, 1, 1], [], []>} : vector<8x16xf32>, vector<16x128xf32>, vector<8x128xf32> -> vector<8x128xf32>
    %c0_98 = arith.constant 0 : index
    %c0_99 = arith.constant 0 : index
    %313 = vector.load %arg15[%c0_98, %c0_99] : memref<8x16xf32, #tpu.memory_space<vmem>>, vector<8x16xf32>
    %c16 = arith.constant 16 : index
    %c0_100 = arith.constant 0 : index
    %314 = vector.load %arg9[%c16, %c0_100] : memref<32x128xf32, #tpu.memory_space<vmem>>, vector<16x128xf32>
    %cst_101 = arith.constant dense<0.000000e+00> : vector<8x128xf32>
    %315 = tpu.matmul %313, %314, %cst_101 {dimension_numbers = #tpu.dot_dimension_numbers<[1], [0], [0], [1], [0, 0, 1, 1], [], []>} : vector<8x16xf32>, vector<16x128xf32>, vector<8x128xf32> -> vector<8x128xf32>
    %316 = arith.addf %312, %315 : vector<8x128xf32>
    %c0_102 = arith.constant 0 : index
    %c0_103 = arith.constant 0 : index
    %317 = vector.load %arg10[%c0_102, %c0_103] : memref<1x128xf32, #tpu.memory_space<vmem>>, vector<1x128xf32>
    %318 = vector.broadcast %317 : vector<1x128xf32> to vector<8x128xf32>
    %319 = arith.addf %316, %318 : vector<8x128xf32>
    %c3_i32_104 = arith.constant 3 : i32
    %320 = vector.broadcast %c3_i32_104 : i32 to vector<1x5xi32>
    %321 = arith.cmpi eq, %6, %320 : vector<1x5xi32>
    %cst_105 = arith.constant 0.000000e+00 : f32
    %cst_106 = arith.constant -1.000000e+04 : f32
    %322 = vector.broadcast %cst_105 : f32 to vector<1x5xf32>
    %323 = vector.broadcast %cst_106 : f32 to vector<1x5xf32>
    %324 = arith.select %321, %322, %323 : vector<1x5xi1>, vector<1x5xf32>
    %325 = vector.extract_strided_slice %319 {offsets = [0, 0], sizes = [1, 5], strides = [1, 1]} : vector<8x128xf32> to vector<1x5xf32>
    %326 = vector.shape_cast %324 : vector<1x5xf32> to vector<1x5xf32>
    %327 = vector.broadcast %326 : vector<1x5xf32> to vector<5x5xf32>
    %328 = arith.addf %327, %1 : vector<5x5xf32>
    %cst_107 = arith.constant dense<0xFF800000> : vector<5xf32>
    %329 = vector.multi_reduction <maximumf>, %328, %cst_107 [1] : vector<5x5xf32> to vector<5xf32>
    %330 = vector.shape_cast %329 : vector<5xf32> to vector<5x1xf32>
    %331 = vector.broadcast %330 : vector<5x1xf32> to vector<5x5xf32>
    %332 = arith.cmpf oeq, %328, %331 : vector<5x5xf32>
    %c5_i32_108 = arith.constant 5 : i32
    %333 = vector.broadcast %c5_i32_108 : i32 to vector<5x5xi32>
    %334 = arith.select %332, %9, %333 : vector<5x5xi1>, vector<5x5xi32>
    %cst_109 = arith.constant dense<2147483647> : vector<5xi32>
    %335 = vector.multi_reduction <minsi>, %334, %cst_109 [1] : vector<5x5xi32> to vector<5xi32>
    %336 = vector.shape_cast %335 : vector<5xi32> to vector<5x1xi32>
    %337 = arith.cmpi eq, %8, %9 : vector<5x5xi32>
    %338 = vector.shape_cast %325 : vector<1x5xf32> to vector<1x5xf32>
    %339 = vector.broadcast %338 : vector<1x5xf32> to vector<5x5xf32>
    %cst_110 = arith.constant 0.000000e+00 : f32
    %340 = vector.broadcast %cst_110 : f32 to vector<5x5xf32>
    %341 = arith.select %337, %339, %340 : vector<5x5xi1>, vector<5x5xf32>
    %cst_111 = arith.constant dense<0.000000e+00> : vector<5xf32>
    %342 = vector.multi_reduction <add>, %341, %cst_111 [1] : vector<5x5xf32> to vector<5xf32>
    %343 = vector.shape_cast %342 : vector<5xf32> to vector<5x1xf32>
    %344 = arith.addf %330, %343 : vector<5x1xf32>
    %345 = vector.extract_strided_slice %319 {offsets = [1, 0], sizes = [1, 5], strides = [1, 1]} : vector<8x128xf32> to vector<1x5xf32>
    %346 = vector.shape_cast %344 : vector<5x1xf32> to vector<5x1xf32>
    %347 = vector.broadcast %346 : vector<5x1xf32> to vector<5x5xf32>
    %348 = arith.addf %347, %2 : vector<5x5xf32>
    %cst_112 = arith.constant dense<0xFF800000> : vector<5xf32>
    %349 = vector.multi_reduction <maximumf>, %348, %cst_112 [0] : vector<5x5xf32> to vector<5xf32>
    %350 = vector.shape_cast %349 : vector<5xf32> to vector<1x5xf32>
    %351 = vector.broadcast %350 : vector<1x5xf32> to vector<5x5xf32>
    %352 = arith.cmpf oeq, %348, %351 : vector<5x5xf32>
    %c5_i32_113 = arith.constant 5 : i32
    %353 = vector.broadcast %c5_i32_113 : i32 to vector<5x5xi32>
    %354 = arith.select %352, %8, %353 : vector<5x5xi1>, vector<5x5xi32>
    %cst_114 = arith.constant dense<2147483647> : vector<5xi32>
    %355 = vector.multi_reduction <minsi>, %354, %cst_114 [0] : vector<5x5xi32> to vector<5xi32>
    %356 = vector.shape_cast %355 : vector<5xi32> to vector<1x5xi32>
    %357 = arith.addf %350, %345 : vector<1x5xf32>
    %358 = vector.extract_strided_slice %319 {offsets = [2, 0], sizes = [1, 5], strides = [1, 1]} : vector<8x128xf32> to vector<1x5xf32>
    %359 = vector.shape_cast %357 : vector<1x5xf32> to vector<1x5xf32>
    %360 = vector.broadcast %359 : vector<1x5xf32> to vector<5x5xf32>
    %361 = arith.addf %360, %1 : vector<5x5xf32>
    %cst_115 = arith.constant dense<0xFF800000> : vector<5xf32>
    %362 = vector.multi_reduction <maximumf>, %361, %cst_115 [1] : vector<5x5xf32> to vector<5xf32>
    %363 = vector.shape_cast %362 : vector<5xf32> to vector<5x1xf32>
    %364 = vector.broadcast %363 : vector<5x1xf32> to vector<5x5xf32>
    %365 = arith.cmpf oeq, %361, %364 : vector<5x5xf32>
    %c5_i32_116 = arith.constant 5 : i32
    %366 = vector.broadcast %c5_i32_116 : i32 to vector<5x5xi32>
    %367 = arith.select %365, %9, %366 : vector<5x5xi1>, vector<5x5xi32>
    %cst_117 = arith.constant dense<2147483647> : vector<5xi32>
    %368 = vector.multi_reduction <minsi>, %367, %cst_117 [1] : vector<5x5xi32> to vector<5xi32>
    %369 = vector.shape_cast %368 : vector<5xi32> to vector<5x1xi32>
    %370 = arith.cmpi eq, %8, %9 : vector<5x5xi32>
    %371 = vector.shape_cast %358 : vector<1x5xf32> to vector<1x5xf32>
    %372 = vector.broadcast %371 : vector<1x5xf32> to vector<5x5xf32>
    %cst_118 = arith.constant 0.000000e+00 : f32
    %373 = vector.broadcast %cst_118 : f32 to vector<5x5xf32>
    %374 = arith.select %370, %372, %373 : vector<5x5xi1>, vector<5x5xf32>
    %cst_119 = arith.constant dense<0.000000e+00> : vector<5xf32>
    %375 = vector.multi_reduction <add>, %374, %cst_119 [1] : vector<5x5xf32> to vector<5xf32>
    %376 = vector.shape_cast %375 : vector<5xf32> to vector<5x1xf32>
    %377 = arith.addf %363, %376 : vector<5x1xf32>
    %378 = vector.extract_strided_slice %319 {offsets = [3, 0], sizes = [1, 5], strides = [1, 1]} : vector<8x128xf32> to vector<1x5xf32>
    %379 = vector.shape_cast %377 : vector<5x1xf32> to vector<5x1xf32>
    %380 = vector.broadcast %379 : vector<5x1xf32> to vector<5x5xf32>
    %381 = arith.addf %380, %2 : vector<5x5xf32>
    %cst_120 = arith.constant dense<0xFF800000> : vector<5xf32>
    %382 = vector.multi_reduction <maximumf>, %381, %cst_120 [0] : vector<5x5xf32> to vector<5xf32>
    %383 = vector.shape_cast %382 : vector<5xf32> to vector<1x5xf32>
    %384 = vector.broadcast %383 : vector<1x5xf32> to vector<5x5xf32>
    %385 = arith.cmpf oeq, %381, %384 : vector<5x5xf32>
    %c5_i32_121 = arith.constant 5 : i32
    %386 = vector.broadcast %c5_i32_121 : i32 to vector<5x5xi32>
    %387 = arith.select %385, %8, %386 : vector<5x5xi1>, vector<5x5xi32>
    %cst_122 = arith.constant dense<2147483647> : vector<5xi32>
    %388 = vector.multi_reduction <minsi>, %387, %cst_122 [0] : vector<5x5xi32> to vector<5xi32>
    %389 = vector.shape_cast %388 : vector<5xi32> to vector<1x5xi32>
    %390 = arith.addf %383, %378 : vector<1x5xf32>
    %391 = vector.extract_strided_slice %319 {offsets = [4, 0], sizes = [1, 5], strides = [1, 1]} : vector<8x128xf32> to vector<1x5xf32>
    %392 = vector.shape_cast %390 : vector<1x5xf32> to vector<1x5xf32>
    %393 = vector.broadcast %392 : vector<1x5xf32> to vector<5x5xf32>
    %394 = arith.addf %393, %1 : vector<5x5xf32>
    %cst_123 = arith.constant dense<0xFF800000> : vector<5xf32>
    %395 = vector.multi_reduction <maximumf>, %394, %cst_123 [1] : vector<5x5xf32> to vector<5xf32>
    %396 = vector.shape_cast %395 : vector<5xf32> to vector<5x1xf32>
    %397 = vector.broadcast %396 : vector<5x1xf32> to vector<5x5xf32>
    %398 = arith.cmpf oeq, %394, %397 : vector<5x5xf32>
    %c5_i32_124 = arith.constant 5 : i32
    %399 = vector.broadcast %c5_i32_124 : i32 to vector<5x5xi32>
    %400 = arith.select %398, %9, %399 : vector<5x5xi1>, vector<5x5xi32>
    %cst_125 = arith.constant dense<2147483647> : vector<5xi32>
    %401 = vector.multi_reduction <minsi>, %400, %cst_125 [1] : vector<5x5xi32> to vector<5xi32>
    %402 = vector.shape_cast %401 : vector<5xi32> to vector<5x1xi32>
    %403 = arith.cmpi eq, %8, %9 : vector<5x5xi32>
    %404 = vector.shape_cast %391 : vector<1x5xf32> to vector<1x5xf32>
    %405 = vector.broadcast %404 : vector<1x5xf32> to vector<5x5xf32>
    %cst_126 = arith.constant 0.000000e+00 : f32
    %406 = vector.broadcast %cst_126 : f32 to vector<5x5xf32>
    %407 = arith.select %403, %405, %406 : vector<5x5xi1>, vector<5x5xf32>
    %cst_127 = arith.constant dense<0.000000e+00> : vector<5xf32>
    %408 = vector.multi_reduction <add>, %407, %cst_127 [1] : vector<5x5xf32> to vector<5xf32>
    %409 = vector.shape_cast %408 : vector<5xf32> to vector<5x1xf32>
    %410 = arith.addf %396, %409 : vector<5x1xf32>
    %411 = vector.extract_strided_slice %319 {offsets = [5, 0], sizes = [1, 5], strides = [1, 1]} : vector<8x128xf32> to vector<1x5xf32>
    %412 = vector.shape_cast %410 : vector<5x1xf32> to vector<5x1xf32>
    %413 = vector.broadcast %412 : vector<5x1xf32> to vector<5x5xf32>
    %414 = arith.addf %413, %2 : vector<5x5xf32>
    %cst_128 = arith.constant dense<0xFF800000> : vector<5xf32>
    %415 = vector.multi_reduction <maximumf>, %414, %cst_128 [0] : vector<5x5xf32> to vector<5xf32>
    %416 = vector.shape_cast %415 : vector<5xf32> to vector<1x5xf32>
    %417 = vector.broadcast %416 : vector<1x5xf32> to vector<5x5xf32>
    %418 = arith.cmpf oeq, %414, %417 : vector<5x5xf32>
    %c5_i32_129 = arith.constant 5 : i32
    %419 = vector.broadcast %c5_i32_129 : i32 to vector<5x5xi32>
    %420 = arith.select %418, %8, %419 : vector<5x5xi1>, vector<5x5xi32>
    %cst_130 = arith.constant dense<2147483647> : vector<5xi32>
    %421 = vector.multi_reduction <minsi>, %420, %cst_130 [0] : vector<5x5xi32> to vector<5xi32>
    %422 = vector.shape_cast %421 : vector<5xi32> to vector<1x5xi32>
    %423 = arith.addf %416, %411 : vector<1x5xf32>
    %424 = vector.extract_strided_slice %319 {offsets = [6, 0], sizes = [1, 5], strides = [1, 1]} : vector<8x128xf32> to vector<1x5xf32>
    %425 = vector.shape_cast %423 : vector<1x5xf32> to vector<1x5xf32>
    %426 = vector.broadcast %425 : vector<1x5xf32> to vector<5x5xf32>
    %427 = arith.addf %426, %1 : vector<5x5xf32>
    %cst_131 = arith.constant dense<0xFF800000> : vector<5xf32>
    %428 = vector.multi_reduction <maximumf>, %427, %cst_131 [1] : vector<5x5xf32> to vector<5xf32>
    %429 = vector.shape_cast %428 : vector<5xf32> to vector<5x1xf32>
    %430 = vector.broadcast %429 : vector<5x1xf32> to vector<5x5xf32>
    %431 = arith.cmpf oeq, %427, %430 : vector<5x5xf32>
    %c5_i32_132 = arith.constant 5 : i32
    %432 = vector.broadcast %c5_i32_132 : i32 to vector<5x5xi32>
    %433 = arith.select %431, %9, %432 : vector<5x5xi1>, vector<5x5xi32>
    %cst_133 = arith.constant dense<2147483647> : vector<5xi32>
    %434 = vector.multi_reduction <minsi>, %433, %cst_133 [1] : vector<5x5xi32> to vector<5xi32>
    %435 = vector.shape_cast %434 : vector<5xi32> to vector<5x1xi32>
    %436 = arith.cmpi eq, %8, %9 : vector<5x5xi32>
    %437 = vector.shape_cast %424 : vector<1x5xf32> to vector<1x5xf32>
    %438 = vector.broadcast %437 : vector<1x5xf32> to vector<5x5xf32>
    %cst_134 = arith.constant 0.000000e+00 : f32
    %439 = vector.broadcast %cst_134 : f32 to vector<5x5xf32>
    %440 = arith.select %436, %438, %439 : vector<5x5xi1>, vector<5x5xf32>
    %cst_135 = arith.constant dense<0.000000e+00> : vector<5xf32>
    %441 = vector.multi_reduction <add>, %440, %cst_135 [1] : vector<5x5xf32> to vector<5xf32>
    %442 = vector.shape_cast %441 : vector<5xf32> to vector<5x1xf32>
    %443 = arith.addf %429, %442 : vector<5x1xf32>
    %444 = vector.extract_strided_slice %319 {offsets = [7, 0], sizes = [1, 5], strides = [1, 1]} : vector<8x128xf32> to vector<1x5xf32>
    %445 = vector.shape_cast %443 : vector<5x1xf32> to vector<5x1xf32>
    %446 = vector.broadcast %445 : vector<5x1xf32> to vector<5x5xf32>
    %447 = arith.addf %446, %2 : vector<5x5xf32>
    %cst_136 = arith.constant dense<0xFF800000> : vector<5xf32>
    %448 = vector.multi_reduction <maximumf>, %447, %cst_136 [0] : vector<5x5xf32> to vector<5xf32>
    %449 = vector.shape_cast %448 : vector<5xf32> to vector<1x5xf32>
    %450 = vector.broadcast %449 : vector<1x5xf32> to vector<5x5xf32>
    %451 = arith.cmpf oeq, %447, %450 : vector<5x5xf32>
    %c5_i32_137 = arith.constant 5 : i32
    %452 = vector.broadcast %c5_i32_137 : i32 to vector<5x5xi32>
    %453 = arith.select %451, %8, %452 : vector<5x5xi1>, vector<5x5xi32>
    %cst_138 = arith.constant dense<2147483647> : vector<5xi32>
    %454 = vector.multi_reduction <minsi>, %453, %cst_138 [0] : vector<5x5xi32> to vector<5xi32>
    %455 = vector.shape_cast %454 : vector<5xi32> to vector<1x5xi32>
    %456 = arith.addf %449, %444 : vector<1x5xf32>
    %457 = vector.extract_strided_slice %1 {offsets = [4, 0], sizes = [1, 5], strides = [1, 1]} : vector<5x5xf32> to vector<1x5xf32>
    %458 = arith.addf %456, %457 : vector<1x5xf32>
    %cst_139 = arith.constant dense<0xFF800000> : vector<1xf32>
    %459 = vector.multi_reduction <maximumf>, %458, %cst_139 [1] : vector<1x5xf32> to vector<1xf32>
    %460 = vector.shape_cast %459 : vector<1xf32> to vector<1x1xf32>
    %461 = vector.broadcast %460 : vector<1x1xf32> to vector<1x5xf32>
    %462 = arith.cmpf oeq, %458, %461 : vector<1x5xf32>
    %c5_i32_140 = arith.constant 5 : i32
    %463 = vector.broadcast %c5_i32_140 : i32 to vector<1x5xi32>
    %464 = arith.select %462, %6, %463 : vector<1x5xi1>, vector<1x5xi32>
    %cst_141 = arith.constant dense<2147483647> : vector<1xi32>
    %465 = vector.multi_reduction <minsi>, %464, %cst_141 [1] : vector<1x5xi32> to vector<1xi32>
    %466 = vector.shape_cast %465 : vector<1xi32> to vector<1x1xi32>
    %467 = vector.broadcast %466 : vector<1x1xi32> to vector<1x5xi32>
    %468 = arith.cmpi eq, %6, %467 : vector<1x5xi32>
    %c0_i32_142 = arith.constant 0 : i32
    %469 = vector.broadcast %c0_i32_142 : i32 to vector<1x5xi32>
    %470 = arith.select %468, %455, %469 : vector<1x5xi1>, vector<1x5xi32>
    %cst_143 = arith.constant dense<0> : vector<1xi32>
    %471 = vector.multi_reduction <add>, %470, %cst_143 [1] : vector<1x5xi32> to vector<1xi32>
    %472 = vector.shape_cast %471 : vector<1xi32> to vector<1x1xi32>
    %473 = vector.broadcast %472 : vector<1x1xi32> to vector<5x1xi32>
    %474 = arith.cmpi eq, %7, %473 : vector<5x1xi32>
    %c0_i32_144 = arith.constant 0 : i32
    %475 = vector.broadcast %c0_i32_144 : i32 to vector<5x1xi32>
    %476 = arith.select %474, %435, %475 : vector<5x1xi1>, vector<5x1xi32>
    %cst_145 = arith.constant dense<0> : vector<1xi32>
    %477 = vector.multi_reduction <add>, %476, %cst_145 [0] : vector<5x1xi32> to vector<1xi32>
    %478 = vector.shape_cast %477 : vector<1xi32> to vector<1x1xi32>
    %479 = vector.broadcast %478 : vector<1x1xi32> to vector<1x5xi32>
    %480 = arith.cmpi eq, %6, %479 : vector<1x5xi32>
    %c0_i32_146 = arith.constant 0 : i32
    %481 = vector.broadcast %c0_i32_146 : i32 to vector<1x5xi32>
    %482 = arith.select %480, %422, %481 : vector<1x5xi1>, vector<1x5xi32>
    %cst_147 = arith.constant dense<0> : vector<1xi32>
    %483 = vector.multi_reduction <add>, %482, %cst_147 [1] : vector<1x5xi32> to vector<1xi32>
    %484 = vector.shape_cast %483 : vector<1xi32> to vector<1x1xi32>
    %485 = vector.broadcast %484 : vector<1x1xi32> to vector<5x1xi32>
    %486 = arith.cmpi eq, %7, %485 : vector<5x1xi32>
    %c0_i32_148 = arith.constant 0 : i32
    %487 = vector.broadcast %c0_i32_148 : i32 to vector<5x1xi32>
    %488 = arith.select %486, %402, %487 : vector<5x1xi1>, vector<5x1xi32>
    %cst_149 = arith.constant dense<0> : vector<1xi32>
    %489 = vector.multi_reduction <add>, %488, %cst_149 [0] : vector<5x1xi32> to vector<1xi32>
    %490 = vector.shape_cast %489 : vector<1xi32> to vector<1x1xi32>
    %491 = vector.broadcast %490 : vector<1x1xi32> to vector<1x5xi32>
    %492 = arith.cmpi eq, %6, %491 : vector<1x5xi32>
    %c0_i32_150 = arith.constant 0 : i32
    %493 = vector.broadcast %c0_i32_150 : i32 to vector<1x5xi32>
    %494 = arith.select %492, %389, %493 : vector<1x5xi1>, vector<1x5xi32>
    %cst_151 = arith.constant dense<0> : vector<1xi32>
    %495 = vector.multi_reduction <add>, %494, %cst_151 [1] : vector<1x5xi32> to vector<1xi32>
    %496 = vector.shape_cast %495 : vector<1xi32> to vector<1x1xi32>
    %497 = vector.broadcast %496 : vector<1x1xi32> to vector<5x1xi32>
    %498 = arith.cmpi eq, %7, %497 : vector<5x1xi32>
    %c0_i32_152 = arith.constant 0 : i32
    %499 = vector.broadcast %c0_i32_152 : i32 to vector<5x1xi32>
    %500 = arith.select %498, %369, %499 : vector<5x1xi1>, vector<5x1xi32>
    %cst_153 = arith.constant dense<0> : vector<1xi32>
    %501 = vector.multi_reduction <add>, %500, %cst_153 [0] : vector<5x1xi32> to vector<1xi32>
    %502 = vector.shape_cast %501 : vector<1xi32> to vector<1x1xi32>
    %503 = vector.broadcast %502 : vector<1x1xi32> to vector<1x5xi32>
    %504 = arith.cmpi eq, %6, %503 : vector<1x5xi32>
    %c0_i32_154 = arith.constant 0 : i32
    %505 = vector.broadcast %c0_i32_154 : i32 to vector<1x5xi32>
    %506 = arith.select %504, %356, %505 : vector<1x5xi1>, vector<1x5xi32>
    %cst_155 = arith.constant dense<0> : vector<1xi32>
    %507 = vector.multi_reduction <add>, %506, %cst_155 [1] : vector<1x5xi32> to vector<1xi32>
    %508 = vector.shape_cast %507 : vector<1xi32> to vector<1x1xi32>
    %509 = vector.broadcast %508 : vector<1x1xi32> to vector<5x1xi32>
    %510 = arith.cmpi eq, %7, %509 : vector<5x1xi32>
    %c0_i32_156 = arith.constant 0 : i32
    %511 = vector.broadcast %c0_i32_156 : i32 to vector<5x1xi32>
    %512 = arith.select %510, %336, %511 : vector<5x1xi1>, vector<5x1xi32>
    %cst_157 = arith.constant dense<0> : vector<1xi32>
    %513 = vector.multi_reduction <add>, %512, %cst_157 [0] : vector<5x1xi32> to vector<1xi32>
    %514 = vector.shape_cast %513 : vector<1xi32> to vector<1x1xi32>
    %c0_i32_158 = arith.constant 0 : i32
    %515 = vector.broadcast %c0_i32_158 : i32 to vector<1x128xi32>
    %516 = arith.cmpi eq, %10, %515 : vector<1x128xi32>
    %cst_159 = arith.constant 0.000000e+00 : f32
    %517 = vector.shape_cast %460 : vector<1x1xf32> to vector<1x1xf32>
    %518 = vector.broadcast %517 : vector<1x1xf32> to vector<1x128xf32>
    %519 = vector.broadcast %cst_159 : f32 to vector<1x128xf32>
    %520 = arith.select %516, %518, %519 : vector<1x128xi1>, vector<1x128xf32>
    %c1_i32_160 = arith.constant 1 : i32
    %521 = vector.broadcast %c1_i32_160 : i32 to vector<1x128xi32>
    %522 = arith.cmpi eq, %10, %521 : vector<1x128xi32>
    %523 = arith.sitofp %514 : vector<1x1xi32> to vector<1x1xf32>
    %524 = vector.shape_cast %523 : vector<1x1xf32> to vector<1x1xf32>
    %525 = vector.broadcast %524 : vector<1x1xf32> to vector<1x128xf32>
    %526 = arith.select %522, %525, %520 : vector<1x128xi1>, vector<1x128xf32>
    %cst_161 = arith.constant 0.000000e+00 : f32
    %527 = vector.broadcast %cst_161 : f32 to vector<1x128xf32>
    %c0_i32_162 = arith.constant 0 : i32
    %528 = vector.broadcast %c0_i32_162 : i32 to vector<1x128xi32>
    %529 = arith.cmpi eq, %10, %528 : vector<1x128xi32>
    %530 = arith.sitofp %508 : vector<1x1xi32> to vector<1x1xf32>
    %531 = vector.shape_cast %530 : vector<1x1xf32> to vector<1x1xf32>
    %532 = vector.broadcast %531 : vector<1x1xf32> to vector<1x128xf32>
    %533 = arith.select %529, %532, %527 : vector<1x128xi1>, vector<1x128xf32>
    %c1_i32_163 = arith.constant 1 : i32
    %534 = vector.broadcast %c1_i32_163 : i32 to vector<1x128xi32>
    %535 = arith.cmpi eq, %10, %534 : vector<1x128xi32>
    %536 = arith.sitofp %502 : vector<1x1xi32> to vector<1x1xf32>
    %537 = vector.shape_cast %536 : vector<1x1xf32> to vector<1x1xf32>
    %538 = vector.broadcast %537 : vector<1x1xf32> to vector<1x128xf32>
    %539 = arith.select %535, %538, %533 : vector<1x128xi1>, vector<1x128xf32>
    %c2_i32_164 = arith.constant 2 : i32
    %540 = vector.broadcast %c2_i32_164 : i32 to vector<1x128xi32>
    %541 = arith.cmpi eq, %10, %540 : vector<1x128xi32>
    %542 = arith.sitofp %496 : vector<1x1xi32> to vector<1x1xf32>
    %543 = vector.shape_cast %542 : vector<1x1xf32> to vector<1x1xf32>
    %544 = vector.broadcast %543 : vector<1x1xf32> to vector<1x128xf32>
    %545 = arith.select %541, %544, %539 : vector<1x128xi1>, vector<1x128xf32>
    %c3_i32_165 = arith.constant 3 : i32
    %546 = vector.broadcast %c3_i32_165 : i32 to vector<1x128xi32>
    %547 = arith.cmpi eq, %10, %546 : vector<1x128xi32>
    %548 = arith.sitofp %490 : vector<1x1xi32> to vector<1x1xf32>
    %549 = vector.shape_cast %548 : vector<1x1xf32> to vector<1x1xf32>
    %550 = vector.broadcast %549 : vector<1x1xf32> to vector<1x128xf32>
    %551 = arith.select %547, %550, %545 : vector<1x128xi1>, vector<1x128xf32>
    %c4_i32_166 = arith.constant 4 : i32
    %552 = vector.broadcast %c4_i32_166 : i32 to vector<1x128xi32>
    %553 = arith.cmpi eq, %10, %552 : vector<1x128xi32>
    %554 = arith.sitofp %484 : vector<1x1xi32> to vector<1x1xf32>
    %555 = vector.shape_cast %554 : vector<1x1xf32> to vector<1x1xf32>
    %556 = vector.broadcast %555 : vector<1x1xf32> to vector<1x128xf32>
    %557 = arith.select %553, %556, %551 : vector<1x128xi1>, vector<1x128xf32>
    %c5_i32_167 = arith.constant 5 : i32
    %558 = vector.broadcast %c5_i32_167 : i32 to vector<1x128xi32>
    %559 = arith.cmpi eq, %10, %558 : vector<1x128xi32>
    %560 = arith.sitofp %478 : vector<1x1xi32> to vector<1x1xf32>
    %561 = vector.shape_cast %560 : vector<1x1xf32> to vector<1x1xf32>
    %562 = vector.broadcast %561 : vector<1x1xf32> to vector<1x128xf32>
    %563 = arith.select %559, %562, %557 : vector<1x128xi1>, vector<1x128xf32>
    %c6_i32_168 = arith.constant 6 : i32
    %564 = vector.broadcast %c6_i32_168 : i32 to vector<1x128xi32>
    %565 = arith.cmpi eq, %10, %564 : vector<1x128xi32>
    %566 = arith.sitofp %472 : vector<1x1xi32> to vector<1x1xf32>
    %567 = vector.shape_cast %566 : vector<1x1xf32> to vector<1x1xf32>
    %568 = vector.broadcast %567 : vector<1x1xf32> to vector<1x128xf32>
    %569 = arith.select %565, %568, %563 : vector<1x128xi1>, vector<1x128xf32>
    %c7_i32_169 = arith.constant 7 : i32
    %570 = vector.broadcast %c7_i32_169 : i32 to vector<1x128xi32>
    %571 = arith.cmpi eq, %10, %570 : vector<1x128xi32>
    %572 = arith.sitofp %466 : vector<1x1xi32> to vector<1x1xf32>
    %573 = vector.shape_cast %572 : vector<1x1xf32> to vector<1x1xf32>
    %574 = vector.broadcast %573 : vector<1x1xf32> to vector<1x128xf32>
    %575 = arith.select %571, %574, %569 : vector<1x128xi1>, vector<1x128xf32>
    %c0_170 = arith.constant 0 : index
    %c0_171 = arith.constant 0 : index
    %576 = vector.load %arg13[%c0_170, %c0_171] : memref<16x128xf32, #tpu.memory_space<vmem>>, vector<8x128xf32>
    tpu.vector_store %arg13[%c0_170, %c0_171], %319 {strides = array<i32>} : memref<16x128xf32, #tpu.memory_space<vmem>>, vector<8x128xf32>,
    %c8 = arith.constant 8 : index
    %c0_172 = arith.constant 0 : index
    %577 = vector.load %arg13[%c8, %c0_172] : memref<16x128xf32, #tpu.memory_space<vmem>>, vector<1x128xf32>
    tpu.vector_store %arg13[%c8, %c0_172], %526 {strides = array<i32>} : memref<16x128xf32, #tpu.memory_space<vmem>>, vector<1x128xf32>,
    %c9 = arith.constant 9 : index
    %c0_173 = arith.constant 0 : index
    %578 = vector.load %arg13[%c9, %c0_173] : memref<16x128xf32, #tpu.memory_space<vmem>>, vector<1x128xf32>
    tpu.vector_store %arg13[%c9, %c0_173], %575 {strides = array<i32>} : memref<16x128xf32, #tpu.memory_space<vmem>>, vector<1x128xf32>,
    %cst_174 = arith.constant 0.000000e+00 : f32
    %579 = vector.broadcast %cst_174 : f32 to vector<6x128xf32>
    %c10 = arith.constant 10 : index
    %c0_175 = arith.constant 0 : index
    %580 = vector.load %arg13[%c10, %c0_175] : memref<16x128xf32, #tpu.memory_space<vmem>>, vector<6x128xf32>
    tpu.vector_store %arg13[%c10, %c0_175], %579 {strides = array<i32>} : memref<16x128xf32, #tpu.memory_space<vmem>>, vector<6x128xf32>,
    return
  }
  func.func @transform_0(%arg0: i32, %arg1: memref<2x8xi32, #tpu.memory_space<smem>>) -> (i32, i32) {
    %c0_i32 = arith.constant 0 : i32
    %c0_i32_0 = arith.constant 0 : i32
    %c0_i32_1 = arith.constant 0 : i32
    return %c0_i32, %c0_i32_0 : i32, i32
  }
  func.func @transform_1(%arg0: i32, %arg1: memref<2x8xi32, #tpu.memory_space<smem>>) -> (i32, i32) {
    %c0_i32 = arith.constant 0 : i32
    %c0_i32_0 = arith.constant 0 : i32
    %c0_i32_1 = arith.constant 0 : i32
    return %c0_i32, %c0_i32_0 : i32, i32
  }
  func.func @transform_2(%arg0: i32, %arg1: memref<2x8xi32, #tpu.memory_space<smem>>) -> (i32, i32) {
    %c0_i32 = arith.constant 0 : i32
    %c0_i32_0 = arith.constant 0 : i32
    %c0_i32_1 = arith.constant 0 : i32
    return %c0_i32, %c0_i32_0 : i32, i32
  }
  func.func @transform_3(%arg0: i32, %arg1: memref<2x8xi32, #tpu.memory_space<smem>>) -> (i32, i32) {
    %c0_i32 = arith.constant 0 : i32
    %c0_i32_0 = arith.constant 0 : i32
    %c0_i32_1 = arith.constant 0 : i32
    return %c0_i32, %c0_i32_0 : i32, i32
  }
  func.func @transform_4(%arg0: i32, %arg1: memref<2x8xi32, #tpu.memory_space<smem>>) -> (i32, i32) {
    %c0_i32 = arith.constant 0 : i32
    %c0_i32_0 = arith.constant 0 : i32
    %c0_i32_1 = arith.constant 0 : i32
    return %c0_i32, %c0_i32_0 : i32, i32
  }
  func.func @transform_5(%arg0: i32, %arg1: memref<2x8xi32, #tpu.memory_space<smem>>) -> (i32, i32) {
    %c0_i32 = arith.constant 0 : i32
    %c0_i32_0 = arith.constant 0 : i32
    %c0_i32_1 = arith.constant 0 : i32
    return %c0_i32, %c0_i32_0 : i32, i32
  }
  func.func @transform_6(%arg0: i32, %arg1: memref<2x8xi32, #tpu.memory_space<smem>>) -> (i32, i32) {
    %c0_i32 = arith.constant 0 : i32
    %c0_i32_0 = arith.constant 0 : i32
    %c0_i32_1 = arith.constant 0 : i32
    return %c0_i32, %c0_i32_0 : i32, i32
  }
  func.func @transform_7(%arg0: i32, %arg1: memref<2x8xi32, #tpu.memory_space<smem>>) -> (i32, i32) {
    %c0_i32 = arith.constant 0 : i32
    %c0_i32_0 = arith.constant 0 : i32
    %c0_i32_1 = arith.constant 0 : i32
    return %c0_i32, %c0_i32_0 : i32, i32
  }
  func.func @transform_8(%arg0: i32, %arg1: memref<2x8xi32, #tpu.memory_space<smem>>) -> (i32, i32) {
    %c0_i32 = arith.constant 0 : i32
    %c0_i32_0 = arith.constant 0 : i32
    %c0_i32_1 = arith.constant 0 : i32
    return %c0_i32, %c0_i32_0 : i32, i32
  }
  func.func @transform_9(%arg0: i32, %arg1: memref<2x8xi32, #tpu.memory_space<smem>>) -> (i32, i32) {
    %c0_i32 = arith.constant 0 : i32
    %c0_i32_0 = arith.constant 0 : i32
    %c0_i32_1 = arith.constant 0 : i32
    return %c0_i32, %c0_i32_0 : i32, i32
  }
  func.func @transform_10(%arg0: i32, %arg1: memref<2x8xi32, #tpu.memory_space<smem>>) -> (i32, i32) {
    %c0_i32 = arith.constant 0 : i32
    %c0_i32_0 = arith.constant 0 : i32
    %c0_i32_1 = arith.constant 0 : i32
    return %c0_i32, %c0_i32_0 : i32, i32
  }
  func.func @transform_11(%arg0: i32, %arg1: memref<2x8xi32, #tpu.memory_space<smem>>) -> (i32, i32) {
    %c0_i32 = arith.constant 0 : i32
    %c0_i32_0 = arith.constant 0 : i32
    return %arg0, %c0_i32 : i32, i32
  }
}

</mosaic_0001>

<bundles_post_ra>
// kernel: tpu_custom_call.1
= control target key start
LH: loop header
LB: loop body
LE: loop exit
PB: predicated region body
PF: predicated region fallthrough
CT: control target
= control target key end

     0   :  { %s3808_s0 = inlined_call_operand.vmem [shape: s32[2,8], index: 0, kind: input, shape index: {}]   ;;  %s3809_s1 = inlined_call_operand.vmem [shape: f32[50,16], index: 1, kind: input, shape index: {}]   ;;  %s3810_s2 = inlined_call_operand.hbm [shape: f32[16,128], index: 2, kind: input, shape index: {}]   ;;  %s3811_s3 = inlined_call_operand.vmem [shape: f32[16,128], index: 3, kind: input, shape index: {}]   ;;  %s3812_s4 = inlined_call_operand.hbm [shape: f32[1,128], index: 4, kind: input, shape index: {}]   ;;  %s3813_s5 = inlined_call_operand.vmem [shape: f32[32,128], index: 5, kind: input, shape index: {}]   ;;  %s3814_s6 = inlined_call_operand.hbm [shape: f32[1,32], index: 6, kind: input, shape index: {}]   ;;  %s3815_s7 = inlined_call_operand.hbm [shape: f32[1,32], index: 7, kind: input, shape index: {}]   ;;  %s3816_s8 = inlined_call_operand.vmem [shape: f32[32,128], index: 8, kind: input, shape index: {}]   ;;  %s3817_s9 = inlined_call_operand.vmem [shape: f32[1,128], index: 9, kind: input, shape index: {}]   ;;  %s3818_s10 = inlined_call_operand.vmem [shape: f32[5,5], index: 10, kind: input, shape index: {}]   ;;  %s3819_s11 = inlined_call_operand.vmem [shape: f32[5,5], index: 11, kind: input, shape index: {}]   ;;  %s3820_s12 = inlined_call_operand.hbm [shape: f32[32,128], index: 12, kind: output, shape index: {}]  }
   0x1   :  { %3829 = sst [smem:[#allocation25_spill]] %s3810_s2  ;;  %s17_s23 = sshll.u32 %s3808_s0, 4  ;;  %s18_s23 = int_to_ptr.vmem [resolvable:$true] %s17_s23 }
   0x2   :  { %3830 = sst [smem:[#allocation26_spill]] %s3812_s4  ;;  %s2777_s24 = scalar_lea.vmem %s18_s23, 32 }
   0x3   :  { %p2778_p0 = scmp.ne.s32.totalorder %s18_s23, %s2777_s24  ;;  %p2782_p1 = scmp.lt.s32.totalorder %s18_s23, %s18_s23 }
   0x4   :  { %p2783_p2 = scmp.lt.s32.totalorder %s2777_s24, %s2777_s24 }
   0x6   :  { %p2784_p3 = por %p2783_p2, %p2782_p1 }
   0x8   :  { %p2785_p4 = pnand %p2784_p3, %p2778_p0 }
   0xa   :  { %2788 = shalt.err (!%p2785_p4)  }
   0xb   :  { %s2979_s25 = smov [#allocation5]  }
   0xc   :  { %20 = dma.vmem_to_smem %s18_s23, 32, %s2979_s25, [#allocation4] }
   0xd   :  { %2945 = dma.done.wait [#allocation4], 32 }
   0xe   :  { %2946 = vsyncadd [#allocation4], 4294967264 }
   0xf   :  { %22 = sfence }
  0x10   :  { %23 = vsyncpa [#allocation7], 0 }
  0x11   :  { %24 = vsyncpa [#allocation10], 0 }
  0x12   :  { %25 = vsyncpa [#allocation13], 0 }
  0x13   :  { %26 = vsyncpa [#allocation8], 0 }
  0x14   :  { %28 = vsyncpa [#allocation8 + $0x1], 0  ;;  %s3064_s26 = smov 0   ;;  %s3066_s0 = smov 0  }
  0x15   :  { %s3068_s27 = smov 0   ;;  %s3070_s28 = smov 0  }
  0x16 LB: > { %3831 = sst [smem:[#allocation20_spill]] %s2965_s26  ;;  %s3085_s29 = sadd.s32 4294967295, %s2977_s28   ;;  %s2977_s28 = sphi %s3070_s28, %s3854_s28   ;;  %s2973_s27 = sphi %s3068_s27, %s3856_s27   ;;  %s2969_s0 = sphi %s3066_s0, %s3858_s0   ;;  %s2965_s26 = sphi %s3064_s26, %s3857_s26  }
  0x17   : > { %3832 = sst [smem:[#allocation21_spill]] %s2973_s27  ;;  %s2323_s30 = sadd.s32 4294967294, %s2977_s28  }
  0x18   : > { %s3089_s13 = sadd.s32 1, %s2977_s28   ;;  %s272_s14 = sadd.s32 1, %s2973_s27 }
  0x19   : > { %3833 = sst [smem:[#allocation22_spill]] %s3089_s13  ;;  %s269_s15 = ssub.s32 %s2977_s28, %s3089_s13 }
  0x1a   : > { %p282_p5 = scmp.ne.s32.totalorder %s2973_s27, %s2969_s0  ;;  %p270_p6 = scmp.eq.s32.totalorder %s269_s15, 0 }
  0x1b   : > { %p283_p7 = scmp.eq.s32.totalorder %s3085_s29, 1  ;;  %p288_p8 = scmp.ne.s32.totalorder %s2969_s0, %s2965_s26 }
  0x1c   : > { %p289_p9 = scmp.eq.s32.totalorder %s2323_s30, 1  ;;  %p2324_p12 = scmp.ge.s32.totalorder %s2977_s28, 1 }
  0x1d   : > { %s3100_s16 = scalar_select %p270_p6, %s2973_s27, %s272_s14  }
  0x1e   : > { %p3102_p10 = por %p283_p7, %p282_p5  ;;  %p3106_p11 = por %p289_p9, %p288_p8 }
  0x1f   : > { %3834 = sst [smem:[#allocation23_spill]] %s3100_s16  ;;  %p296_p13 = scmp.lt.s32.totalorder %s2977_s28, 3 }
  0x20   : > { %s3835_s17 = scalar_select %p3102_p10, 1, 0 }
  0x21   : > { %s3836_s18 = scalar_select %p3106_p11, 1, 0 }
  0x22   : > { %p3824_p0 = scmp.eq.s32.totalorder %s3085_s29, 0  ;;  %p3113_p1 = pnand %p2324_p12, %p296_p13 }
  0x23   : > { %3837 = sst [smem:[#allocation24_spill]] %s3836_s18  ;;  %s2980_s20 = smov [#allocation9]  }
  0x24   : > { %s3838_s19 = scalar_select %p3113_p1, 1, 0 }
  0x25   : > { %s328_s21 = sshll.u32 %s2980_s20, 4  ;;  %p2655_p2 = pneg %p3113_p1  ;;  %s329_s21 = int_to_ptr.vmem [resolvable:$true] %s328_s21 }
  0x26   : > { %s2981_s22 = smov [#allocation6]   ;;  %s2982_s25 = smov [#allocation11]  }
  0x27   : > { %s311_s23 = sshll.u32 %s2981_s22, 4  ;;  %p3121_p3 = pnand %p3824_p0, %p2655_p2  ;;  %s3125_s23 = int_to_ptr.vmem [resolvable:$true] %s311_s23 }
  0x28   : > { %s3127_s30 = sshll.u32 %s2982_s25, 4  ;;  %s3840_s4 = sld [smem:[#allocation26_spill]]  ;;  %s343_s30 = int_to_ptr.vmem [resolvable:$true] %s3127_s30 }
  0x29   : > { %p3137_p5 = pneg %p3121_p3 }
  0x2e   : > { %s2789_s20 = scalar_lea.hbm %s3840_s4, 16 }
  0x2f   : > { %p2790_p4 = scmp.ne.s32.totalorder %s3840_s4, %s2789_s20  ;;  %p2796_p8 = scmp.lt.u32.totalorder %s2789_s20, %s3840_s4 }
  0x31   : > { %p2792_p6 = pnand %p3137_p5, %p2790_p4 }
  0x33   : > { %p2793_p7 = pneg %p2792_p6 }
  0x35   : > { %p2798_p9 = pnand %p2796_p8, %p2793_p7 }
  0x37   : > { %2801 = shalt.err (!%p2798_p9)
}
  0x38   : > { %s2802_s14 = scalar_lea.vmem %s329_s21, 16  ;;  %s2809_s27 = scalar_lea.vmem %s329_s21, 32 }
  0x39   : > { %p2803_p12 = scmp.ne.s32.totalorder %s329_s21, %s2802_s14  ;;  %p2810_p0 = scmp.lt.s32.totalorder %s329_s21, %s329_s21 }
  0x3a   : > { %p2811_p11 = scmp.lt.s32.totalorder %s2809_s27, %s2802_s14 }
  0x3b   : > { %p2805_p13 = pnand %p2803_p12, %p3137_p5 }
  0x3c   : > { %p2812_p10 = por %p2811_p11, %p2810_p0 }
  0x3d   : > { %p2806_p2 = pneg %p2805_p13 }
  0x3f   : > { %p2813_p1 = pnand %p2812_p10, %p2806_p2 }
  0x41   : > { %2816 = shalt.err (!%p2813_p1)
}
  0x42   : > { %2661 = dma.hbm_to_vmem [thread:$0]  (!%p3121_p3), %s3840_s4, 16, %s329_s21, [#allocation10]  }
  0x43   : > { %s3842_s2 = sld [smem:[#allocation25_spill]] }
  0x49   : > { %s2817_s25 = scalar_lea.hbm %s3842_s2, 256 }
  0x4a   : > { %p2818_p4 = scmp.ne.s32.totalorder %s3842_s2, %s2817_s25  ;;  %p2824_p10 = scmp.lt.u32.totalorder %s2817_s25, %s3842_s2 }
  0x4c   : > { %p2820_p6 = pnand %p2818_p4, %p3137_p5 }
  0x4e   : > { %p2821_p11 = pneg %p2820_p6 }
  0x50   : > { %p2826_p0 = pnand %p2824_p10, %p2821_p11 }
  0x52   : > { %2829 = shalt.err (!%p2826_p0)
}
  0x53   : > { %s2830_s21 = scalar_lea.vmem %s3125_s23, 256  ;;  %p2838_p9 = scmp.lt.s32.totalorder %s3125_s23, %s3125_s23 }
  0x54   : > { %p2831_p1 = scmp.ne.s32.totalorder %s3125_s23, %s2830_s21  ;;  %p2839_p12 = scmp.lt.s32.totalorder %s2830_s21, %s2830_s21 }
  0x56   : > { %p2833_p7 = pnand %p2831_p1, %p3137_p5  ;;  %p2840_p13 = por %p2839_p12, %p2838_p9 }
  0x58   : > { %p2834_p8 = pneg %p2833_p7 }
  0x5a   : > { %p2841_p2 = pnand %p2840_p13, %p2834_p8 }
  0x5c   : > { %2844 = shalt.err (!%p2841_p2)
}
  0x5d   : > { %s2983_s26 = smov 128   ;;  %s2984_s18 = smov 8  }
  0x5e   : > { %2658 = dma.hbm_to_vmem [thread:$0]  (!%p3121_p3), %s3842_s2, 256, %s3125_s23, [#allocation7], %s2983_s26, %s2983_s26, %s2984_s18  }
  0x5f   : > { %s2845_s25 = scalar_lea.hbm %s3814_s6, 16 }
  0x60   : > { %p2846_p4 = scmp.ne.s32.totalorder %s3814_s6, %s2845_s25  ;;  %p2852_p10 = scmp.lt.u32.totalorder %s2845_s25, %s3814_s6 }
  0x62   : > { %p2848_p6 = pnand %p2846_p4, %p3137_p5 }
  0x64   : > { %p2849_p11 = pneg %p2848_p6 }
  0x66   : > { %p2854_p0 = pnand %p2852_p10, %p2849_p11 }
  0x68   : > { %2857 = shalt.err (!%p2854_p0)
}
  0x69   : > { %s2858_s16 = scalar_lea.vmem %s343_s30, 16  ;;  %s2865_s23 = scalar_lea.vmem %s343_s30, 32 }
  0x6a   : > { %p2859_p1 = scmp.ne.s32.totalorder %s343_s30, %s2858_s16  ;;  %p2866_p9 = scmp.lt.s32.totalorder %s343_s30, %s343_s30 }
  0x6b   : > { %p2867_p12 = scmp.lt.s32.totalorder %s2865_s23, %s2858_s16 }
  0x6c   : > { %p2861_p7 = pnand %p2859_p1, %p3137_p5 }
  0x6d   : > { %p2868_p13 = por %p2867_p12, %p2866_p9 }
  0x6e   : > { %p2862_p8 = pneg %p2861_p7 }
  0x70   : > { %p2869_p2 = pnand %p2868_p13, %p2862_p8 }
  0x72   : > { %2872 = shalt.err (!%p2869_p2)
}
  0x73   : > { %2664 = dma.hbm_to_vmem [thread:$0]  (!%p3121_p3), %s3814_s6, 16, %s343_s30, [#allocation10]  }
  0x74   : > { %s2985_s4 = smov [#allocation12]   ;;  %s2873_s25 = scalar_lea.hbm %s3815_s7, 16 }
  0x75   : > { %s353_s15 = sshll.u32 %s2985_s4, 4  ;;  %p2874_p4 = scmp.ne.s32.totalorder %s3815_s7, %s2873_s25  ;;  %s354_s15 = int_to_ptr.vmem [resolvable:$true] %s353_s15 }
  0x76   : > { %p2880_p10 = scmp.lt.u32.totalorder %s2873_s25, %s3815_s7 }
  0x77   : > { %p2876_p6 = pnand %p2874_p4, %p3137_p5 }
  0x79   : > { %p2877_p11 = pneg %p2876_p6 }
  0x7b   : > { %p2882_p0 = pnand %p2880_p10, %p2877_p11 }
  0x7d   : > { %2885 = shalt.err (!%p2882_p0)
}
  0x7e   : > { %s2886_s30 = scalar_lea.vmem %s354_s15, 16  ;;  %s2893_s23 = scalar_lea.vmem %s354_s15, 32 }
  0x7f   : > { %p2887_p1 = scmp.ne.s32.totalorder %s354_s15, %s2886_s30  ;;  %p2894_p9 = scmp.lt.s32.totalorder %s354_s15, %s354_s15 }
  0x80   : > { %p2895_p12 = scmp.lt.s32.totalorder %s2893_s23, %s2886_s30 }
  0x81   : > { %p2889_p7 = pnand %p2887_p1, %p3137_p5 }
  0x82   : > { %p2896_p13 = por %p2895_p12, %p2894_p9 }
  0x83   : > { %p2890_p8 = pneg %p2889_p7 }
  0x85   : > { %p2897_p2 = pnand %p2896_p13, %p2890_p8 }
  0x87   : > { %2900 = shalt.err (!%p2897_p2)
}
  0x88   : > { %2667 = dma.hbm_to_vmem [thread:$0]  (!%p3121_p3), %s3815_s7, 16, %s354_s15, [#allocation13]  }
  0x89   : > { %p3843_p4 = scmp.ne.s32.totalorder %s3838_s19, 0 }
  0x8a   : > { %p3844_p6 = scmp.eq.s32.totalorder (!%p3843_p4), %s3085_s29, 0 }
  0x8b   : > { %378 = sbr.rel (%p3843_p4) target bundleno = 8226 (0x2022), region = 64 }
  0x92   : > { %2948 = dma.done.wait (%p3844_p6), [#allocation7], 256   ;;  %p3845_p5 = pmov %p3844_p6 }
  0x94   : > { %2950 = vsyncadd (%p3845_p5), [#allocation7], 4294967040  ;;  %p3846_p11 = pmov %p3845_p5 }
  0x95   : > { %p3847_p10 = pmov %p3845_p5 }
  0x96   : > { %2952 = dma.done.wait (%p3846_p11), [#allocation10], 32  }
  0x97   : > { %2954 = vsyncadd (%p3847_p10), [#allocation10], 4294967264  ;;  %p3848_p0 = pmov %p3845_p5 }
  0x99   : > { %2956 = dma.done.wait (%p3848_p0), [#allocation13], 16   ;;  %p3849_p3 = pmov %p3848_p0 }
  0x9a   : > { %v2986_v0 = vmov 0.0|0.0   ;;  %vm2987_vm0 = vmmov 0   ;;  %v2988_v1 = vmov 0.0   ;;  %v435_v2 = vlaneseq  ;;  %s3231_s19 = sshll.u32 %s3085_s29, 7  ;;  %v495_v5 = vld [vmem:[%s3809_s1] sm:$0xff]  ;;  %v496_v6 = vld [vmem:[%s3809_s1 + $0x8] sm:$0xff] }
  0x9b   : > { %2958 = vsyncadd (%p3849_p3), [#allocation13], 4294967280  ;;  %2568 = vmatprep.subr.bf16.mxu0 %v2986_v0  ;;  %2449 = vmatprep.mubr.msk.f32.mxu0 %vm2987_vm0, %v2988_v1  ;;  %s441_s24 = sld [smem:[#allocation5 + %s3231_s19]]  ;;  %s447_s22 = sadd.s32 1, %s3231_s19  ;;  %v497_v7 = vld [vmem:[%s3809_s1 + $0x10] sm:$0xff]  ;;  %v2569_v8 = vpack.c.bf16 %v496_v6, %v495_v5  ;;  %v498_v9 = vld [vmem:[%s3809_s1 + $0x18] sm:$0xff] }
  0x9c   : > { %2577 = vmatprep.subr.bf16.mxu1 %v2986_v0  ;;  %2456 = vmatprep.mubr.msk.f32.mxu1 %vm2987_vm0, %v2988_v1  ;;  %v3238_v3 = vshrl.u32 %v435_v2, 7  ;;  %s3240_s4 = sld [smem:[#allocation5 + %s447_s22]]  ;;  %s454_s15 = sadd.s32 2, %s3231_s19  ;;  %v3246_v4 = vand.u32 127, %v435_v2  ;;  %v580_v12 = vld [vmem:[#allocation6] sm:$0xff]  ;;  %v581_v13 = vld [vmem:[#allocation6 + $0x8] sm:$0xff]  ;;  %v2572_v14 = vpack.c.bf16 %v498_v9, %v497_v7 }
  0x9d   : > { %s3243_s13 = sld [smem:[#allocation5 + %s454_s15]]  ;;  %s461_s20 = sadd.s32 3, %s3231_s19  ;;  %2570 = vmatpush3.bf16.msra.mxu0 %v2569_v8  ;;  %v2578_v16 = vpack.c.bf16 %v581_v13, %v580_v12  ;;  %v499_v17 = vld [vmem:[%s3809_s1 + $0x20] sm:$0xff]  ;;  %v500_v18 = vld [vmem:[%s3809_s1 + $0x28] sm:$0xff]  ;;  %v501_v32 = vld [vmem:[%s3809_s1 + $0x30] sm:$0x3] }
  0x9e   : > { %s3248_s25 = sld [smem:[#allocation5 + %s461_s20]]  ;;  %s468_s14 = sadd.s32 4, %s3231_s19  ;;  %vm439_vm1 = vcmp.eq.s32.totalorder %v3238_v3, 0  ;;  %vm446_vm2 = vcmp.eq.s32.totalorder %v3238_v3, 1  ;;  %vm453_vm3 = vcmp.eq.s32.totalorder %v3238_v3, 2  ;;  %vm460_vm5 = vcmp.eq.s32.totalorder %v3238_v3, 3  ;;  %2571 = vmatprep.subr.bf16.mxu0 %v2986_v0 }
  0x9f   : > { %s3251_s27 = sld [smem:[#allocation5 + %s468_s14]]  ;;  %s475_s21 = sadd.s32 5, %s3231_s19  ;;  %vm467_vm6 = vcmp.eq.s32.totalorder %v3238_v3, 4  ;;  %vm474_vm11 = vcmp.eq.s32.totalorder %v3238_v3, 5  ;;  %vm481_vm14 = vcmp.eq.s32.totalorder %v3238_v3, 6  ;;  %2579 = vmatpush3.bf16.msra.mxu1 %v2578_v16  ;;  %v2575_v25 = vpack.c.bf16 %v500_v18, %v499_v17  ;;  %v426_v34 = vld [vmem:[%s3813_s5] sm:$0xff] }
  0xa0   : > { %s3264_s15 = sld [smem:[#allocation5 + %s475_s21]]  ;;  %s482_s20 = sadd.s32 6, %s3231_s19  ;;  %2580 = vmatprep.subr.bf16.mxu1 %v2986_v0  ;;  %v427_v35 = vld [vmem:[%s3813_s5 + $0x8] sm:$0xff]  ;;  %v428_v37 = vld [vmem:[%s3813_s5 + $0x10] sm:$0xff]  ;;  %v429_v38 = vld [vmem:[%s3813_s5 + $0x18] sm:$0xff] }
  0xa1   : > { %v442_v10 = vstv %s441_s24  ;;  %s3272_s16 = sld [smem:[#allocation5 + %s482_s20]]  ;;  %s489_s30 = sadd.s32 7, %s3231_s19  ;;  %2573 = vmatpush3.bf16.msra.mxu0 %v2572_v14  ;;  %v3336_v36 = vpack.c.bf16 %v427_v35, %v426_v34  ;;  %v3346_v39 = vpack.c.bf16 %v429_v38, %v428_v37  ;;  %v662_v40 = vld [vmem:[%s3811_s3] sm:$0xff]  ;;  %v663_v41 = vld [vmem:[%s3811_s3 + $0x8] sm:$0xff] }
  0xa2   : > { %vm443_vm4 = vcmp.eq.s32.totalorder %v3246_v4, %v442_v10  ;;  %v449_v11 = vstv %s3240_s4  ;;  %s3279_s21 = sld [smem:[#allocation5 + %s489_s30]]  ;;  %2574 = vmatprep.subr.bf16.mxu0 %v2986_v0  ;;  %v2581_v42 = vpack.c.bf16 %v663_v41, %v662_v40  ;;  %v433_v45 = vld [vmem:[#allocation11] sm:$0x1]  ;;  %v2338_v47 = vld [vmem:[#allocation9] ss:$0 sm:$0xff]  ;;  %s2989_s19 = smov 64  }
  0xa3   : > { %vm444_vm7 = vmand %vm439_vm1, %vm443_vm4  ;;  %vm450_vm8 = vcmp.eq.s32.totalorder %v3246_v4, %v449_v11  ;;  %v456_v15 = vstv %s3243_s13  ;;  %v2344_v9 = vld [vmem:[#allocation12] ss:$0 sm:$0xff]  ;;  %s2990_s24 = smov 32   ;;  %s2991_s4 = smov 16  }
  0xa4   : > { %v445_v19 = vsel %vm444_vm7, 1.0, %v2988_v1  ;;  %vm451_vm9 = vmand %vm446_vm2, %vm450_vm8  ;;  %vm457_vm10 = vcmp.eq.s32.totalorder %v3246_v4, %v456_v15  ;;  %v463_v20 = vstv %s3248_s25  ;;  %vm488_vm2 = vcmp.eq.s32.totalorder %v3238_v3, 7  ;;  %s2374_s13 = sshll.u32 %s3085_s29, 8  ;;  %p3850_p7 = scmp.ne.s32.totalorder %s3835_s17, 0 }
  0xa5   : > { %v452_v21 = vsel %vm451_vm9, 1.0, %v445_v19  ;;  %vm458_vm12 = vmand %vm453_vm3, %vm457_vm10  ;;  %vm464_vm13 = vcmp.eq.s32.totalorder %v3246_v4, %v463_v20  ;;  %v470_v22 = vstv %s3251_s27  ;;  %2576 = vmatpush3.bf16.msra.mxu0 %v2575_v25  ;;  %vm506_vm10 = vcmask 1041408   ;;  %s3755_s26 = scalar_lea.hbm %s3820_s12, %s2374_s13  ;;  %s2993_s22 = smov [#allocation14]  }
  0xa6   : > { %v459_v23 = vsel %vm458_vm12, 1.0, %v452_v21  ;;  %vm465_vm15 = vmand %vm460_vm5, %vm464_vm13  ;;  %vm471_vm1 = vcmp.eq.s32.totalorder %v3246_v4, %v470_v22  ;;  %v477_v24 = vstv %s3264_s15  ;;  %2447 = vmatprep.subr.mxu0 %v2988_v1  ;;  %vm588_vm12 = vcmask 130048   ;;  %s2905_s15 = sshll.u32 %s2993_s22, 4  ;;  %s2906_s15 = int_to_ptr.vmem [resolvable:$false] %s2905_s15 }
  0xa7   : > { %v466_v26 = vsel %vm465_vm15, 1.0, %v459_v23  ;;  %vm472_vm3 = vmand %vm467_vm6, %vm471_vm1  ;;  %vm478_vm4 = vcmp.eq.s32.totalorder %v3246_v4, %v477_v24  ;;  %v484_v27 = vstv %s3272_s16  ;;  %vm738_vm13 = vcmask 261120   ;;  %s422_s16 = sand.u32 1, %s2969_s0   ;;  %s2907_s20 = scalar_lea.vmem %s2906_s15, 512 }
  0xa8   : > { %v473_v28 = vsel %vm472_vm3, 1.0, %v466_v26  ;;  %vm479_vm5 = vmand %vm474_vm11, %vm478_vm4  ;;  %vm485_vm7 = vcmp.eq.s32.totalorder %v3246_v4, %v484_v27  ;;  %v491_v29 = vstv %s3279_s21  ;;  %vm502_vm11 = vcmask 408576   ;;  %s2334_s30 = sshll.u32 %s422_s16, 4  ;;  %s3767_s29 = scalar_lea.sflag [#allocation8], %s422_s16 }
  0xa9   : > { %v480_v30 = vsel %vm479_vm5, 1.0, %v473_v28  ;;  %vm486_vm8 = vmand %vm481_vm14, %vm485_vm7  ;;  %vm492_vm9 = vcmp.eq.s32.totalorder %v3246_v4, %v491_v29  ;;  %2448 = vmatpush3.msk.msra.mxu0 %vm506_vm10, %v501_v32  ;;  %vm850_vm14 = vcmask 122880   ;;  %vm1087_vm15 = vcmask 124930   ;;  %s3556_s21 = scalar_lea.vmem [#allocation14], %s2334_s30 }
  0xaa   : > { %v487_v31 = vsel %vm486_vm8, 1.0, %v480_v30  ;;  %vm493_vm6 = vmand %vm488_vm2, %vm492_vm9  ;;  %2589 = vmatprep.subr.bf16.mxu0 %v2986_v0  ;;  %vm1324_vm1 = vcmask 126980   ;;  %vm1558_vm2 = vcmask 129030   ;;  %vm967_vm3 = vcmask 123905   ;;  %2217 = vst [vmem:[%s3556_s21 + $0xa] sm:$0x3f] %v2988_v1 }
  0xab   : > { %v494_v33 = vsel %vm493_vm6, 1.0, %v487_v31  ;;  %vm1207_vm4 = vcmask 125955   ;;  %vm1441_vm5 = vcmask 128005   ;;  %vm1675_vm7 = vcmask 130055   ;;  %s2232_s25 = sshll.u32 %s3556_s21, 4  ;;  %s3757_s25 = int_to_ptr.vmem [resolvable:$true] %s2232_s25 }
  0xac   : > { %2450 = vmatmul.mubr.msk.f32.vlgmr.msra.gmra.mrb[0].mxu0 %vm502_vm11, %v494_v33  ;;  %vm1841_vm8 = vcmp.eq.s32.totalorder %v3246_v4, 3  ;;  %vm1844_vm9 = vcmask 36864   ;;  %s2901_s18 = scalar_lea.vmem %s3757_s25, 256  ;;  %p2908_p12 = scmp.lt.s32.totalorder %s3757_s25, %s2906_s15 }
  0xad   : > { %2485 = vmatprep.mubr.msk.f32.mxu0 %vm2987_vm0, %v2988_v1  ;;  %2591 = vmatpush3.bf16.msra.mxu0 %v3336_v36  ;;  %p2902_p1 = scmp.ne.s32.totalorder %s3757_s25, %s2901_s18  ;;  %p2909_p13 = scmp.lt.s32.totalorder %s2907_s20, %s2901_s18 }
  0xae   : > { %2592 = vmatprep.subr.bf16.mxu0 %v2986_v0 }
  0xaf   : > { %p2903_p8 = pnand %p2902_p1, %p3850_p7  ;;  %p2910_p2 = por %p2909_p13, %p2908_p12 }
  0xb1   : > { %2594 = vmatpush3.bf16.msra.mxu0 %v3346_v39  ;;  %p2904_p9 = pneg %p2903_p8 }
  0xb2   : > { %2601 = vmatprep.subr.bf16.mxu0 %v2986_v0 }
  0xb3   : > { %p2911_p4 = pnand %p2910_p2, %p2904_p9 }
 0x17f   : > { %v576_v43 = vpop.f32.mrb[0].mxu0 }
 0x180   : > { %v2451_v44 = vpop.f32.mrb[1].mxu0  ;;  %2457 = vmatmul.mubr.msk.f32.vlgmr.msra.gmra.mrb[0].mxu1 %vm588_vm12, %v576_v43 }
 0x181   : > { %2582 = vmatpush3.bf16.msra.mxu1 %v2581_v42  ;;  %2463 = vmatprep.mubr.msk.f32.mxu1 %vm2987_vm0, %v2988_v1 }
 0x182   : > { %2583 = vmatprep.subr.bf16.mxu1 %v2986_v0 }
 0x184   : > { %2464 = vmatmul.mubr.msk.f32.vlgmr.msra.gmra.mrb[2].mxu1 %vm588_vm12, %v576_v43 }
 0x185   : > { %2585 = vmatpush3.bf16.msra.mxu1 %v3336_v36  ;;  %2474 = vmatprep.mubr.msk.f32.mxu1 %vm2987_vm0, %v2988_v1 }
 0x186   : > { %2586 = vmatprep.subr.bf16.mxu1 %v2986_v0 }
 0x189   : > { %2588 = vmatpush3.bf16.msra.mxu1 %v3346_v39 }
 0x18a   : > { %2595 = vmatprep.subr.bf16.mxu1 %v2986_v0 }
 0x18c   : > { %2475 = vmatmul.mubr.msk.f32.vlgmr.msra.gmra.mrb[4].mxu1 %vm738_vm13, %v433_v45 }
 0x18d   : > { %2597 = vmatpush3.bf16.msra.mxu1 %v3336_v36  ;;  %2496 = vmatprep.mubr.msk.f32.mxu1 %vm2987_vm0, %v2988_v1 }
 0x18e   : > { %2598 = vmatprep.subr.bf16.mxu1 %v2986_v0 }
 0x191   : > { %2600 = vmatpush3.bf16.msra.mxu1 %v3346_v39 }
 0x192   : > { %2607 = vmatprep.subr.bf16.mxu1 %v2986_v0 }
 0x253   : > { %v658_v46 = vpop.f32.mrb[0].mxu1 }
 0x254   : > { %v2458_v48 = vpop.f32.mrb[1].mxu1  ;;  %v659_v49 = vadd.f32 %v2338_v47, %v658_v46 }
 0x257   : > { %v730_v50 = vpop.f32.mrb[2].mxu1 }
 0x258   : > { %v856_v51 = vrot.slane %v730_v50, 5  ;;  %v973_v52 = vrot.slane %v730_v50, 3  ;;  %v1093_v53 = vrot.slane %v730_v50, 1  ;;  %v2465_v54 = vpop.f32.mrb[3].mxu1  ;;  %v735_v55 = vrot.slane %v730_v50, 7 }
 0x25a   : > { %v3374_v56 = vadd.f32 %v735_v55, %v659_v49  ;;  %v3376_v57 = vadd.f32 %v856_v51, %v659_v49  ;;  %v3378_v58 = vadd.f32 %v973_v52, %v659_v49  ;;  %v3380_v59 = vadd.f32 %v1093_v53, %v659_v49 }
 0x25f   : > { %v808_v60 = vpop.f32.mrb[4].mxu1 }
 0x260   : > { %v812_v61 = vadd.f32 %v808_v60, %v3374_v56  ;;  %v2476_v62 = vpop.f32.mrb[5].mxu1 }
 0x262   : > { %v2342_v63 = vmul.f32 -1.442695, %v812_v61 }
 0x264   : > { %2729 = vpow2.f32 %v2342_v63 }
 0x26e   : > { %v2730_v2 = vpop.eup %2729 }
 0x26f   : > { %v816_v5 = vadd.f32 1.0, %v2730_v2 }
 0x271   : > { %2731 = vrcp.f32 %v816_v5 }
 0x27b   : > { %v2732_v6 = vpop.eup %2731 }
 0x27c   : > { %v819_v7 = vmul.f32 2.0, %v2732_v6 }
 0x27e   : > { %v2343_v8 = vadd.f32 -1.0, %v819_v7 }
 0x280   : > { %831 = vrot.lane.b32.xlu0 %v2343_v8, %s2989_s19 }
 0x284   : > { %826 = vrot.lane.b32.xlu0 %v2344_v9, %s2990_s24 }
 0x2f2   : > { %v832_v10 = vpop.permute.xlu0 %831 }
 0x2f3   : > { %v834_v11 = vmul.f32 %v2732_v6, %v832_v10 }
 0x2f5   : > { %836 = vrot.lane.b32.xlu1 %v834_v11, %s2990_s24 }
 0x2f6   : > { %v827_v12 = vpop.permute.xlu0 %826 }
 0x2f7   : > { %v829_v13 = vmul.f32 %v2732_v6, %v827_v12 }
 0x367   : > { %v837_v14 = vpop.permute.xlu1 %836 }
 0x368   : > { %v839_v15 = vadd.f32 %v837_v14, %v829_v13 }
 0x36a   : > { %2733 = vtanh.f32 %v839_v15  ;;  %v944_v32 = vrot.slane %v839_v15, 7 }
 0x374   : > { %v2734_v16 = vpop.eup %2733 }
 0x375   : > { %842 = vrot.lane.b32.xlu1 %v2734_v16, %s2989_s19 }
 0x3e7   : > { %v843_v17 = vpop.permute.xlu1 %842 }
 0x3e8   : > { %v3387_v18 = vmul.f32 %v2732_v6, %v843_v17 }
 0x3ea   : > { %847 = vrot.lane.b32.xlu0 %v3387_v18, %s2990_s24 }
 0x45c   : > { %v848_v19 = vpop.permute.xlu0 %847 }
 0x45d   : > { %851 = vst.msk [vmem:[#allocation2] sm:$0x1] %vm850_vm14, %v848_v19  ;;  %2486 = vmatmul.mubr.msk.f32.vlgmr.msra.gmra.mrb[2].mxu0 %vm738_vm13, %v848_v19 }
 0x45e   : > { %2603 = vmatpush3.bf16.msra.mxu0 %v3336_v36  ;;  %2507 = vmatprep.mubr.msk.f32.mxu0 %vm2987_vm0, %v2988_v1 }
 0x45f   : > { %2604 = vmatprep.subr.bf16.mxu0 %v2986_v0 }
 0x462   : > { %2606 = vmatpush3.bf16.msra.mxu0 %v3346_v39 }
 0x463   : > { %2613 = vmatprep.subr.bf16.mxu0 %v2986_v0 }
 0x530   : > { %v927_v20 = vpop.f32.mrb[2].mxu0 }
 0x531   : > { %v932_v21 = vrot.slane %v927_v20, 7  ;;  %v2487_v22 = vpop.f32.mrb[3].mxu0 }
 0x533   : > { %v934_v23 = vadd.f32 %v932_v21, %v3376_v57 }
 0x535   : > { %v2346_v24 = vmul.f32 -1.442695, %v934_v23 }
 0x537   : > { %2735 = vpow2.f32 %v2346_v24 }
 0x541   : > { %v2736_v25 = vpop.eup %2735 }
 0x542   : > { %v938_v26 = vadd.f32 1.0, %v2736_v25 }
 0x544   : > { %2737 = vrcp.f32 %v938_v26 }
 0x54e   : > { %v2738_v27 = vpop.eup %2737 }
 0x54f   : > { %v941_v28 = vmul.f32 2.0, %v2738_v27  ;;  %v946_v33 = vmul.f32 %v2738_v27, %v944_v32 }
 0x551   : > { %v2347_v29 = vadd.f32 -1.0, %v941_v28 }
 0x553   : > { %948 = vrot.lane.b32.xlu1 %v2347_v29, %s2989_s19 }
 0x5c5   : > { %v949_v30 = vpop.permute.xlu1 %948 }
 0x5c6   : > { %v951_v31 = vmul.f32 %v2738_v27, %v949_v30 }
 0x5c8   : > { %953 = vrot.lane.b32.xlu0 %v951_v31, %s2990_s24 }
 0x63a   : > { %v954_v34 = vpop.permute.xlu0 %953 }
 0x63b   : > { %v956_v35 = vadd.f32 %v954_v34, %v946_v33 }
 0x63d   : > { %2739 = vtanh.f32 %v956_v35  ;;  %v1064_v55 = vrot.slane %v956_v35, 7 }
 0x647   : > { %v2740_v37 = vpop.eup %2739 }
 0x648   : > { %959 = vrot.lane.b32.xlu1 %v2740_v37, %s2989_s19 }
 0x6ba   : > { %v960_v38 = vpop.permute.xlu1 %959 }
 0x6bb   : > { %v3403_v40 = vmul.f32 %v2738_v27, %v960_v38 }
 0x6bd   : > { %v976_v41 = vrot.slane %v3403_v40, 1 }
 0x6bf   : > { %977 = vrot.lane.b32.xlu0 %v976_v41, %s2990_s24 }
 0x731   : > { %v978_v42 = vpop.permute.xlu0 %977 }
 0x732   : > { %2497 = vmatmul.mubr.msk.f32.vlgmr.msra.gmra.mrb[6].mxu1 %vm738_vm13, %v978_v42 }
 0x733   : > { %2609 = vmatpush3.bf16.msra.mxu1 %v3336_v36  ;;  %2518 = vmatprep.mubr.msk.f32.mxu1 %vm2987_vm0, %v2988_v1 }
 0x734   : > { %2610 = vmatprep.subr.bf16.mxu1 %v2986_v0 }
 0x737   : > { %2612 = vmatpush3.bf16.msra.mxu1 %v3346_v39 }
 0x738   : > { %2619 = vmatprep.subr.bf16.mxu1 %v2986_v0 }
 0x805   : > { %v1047_v43 = vpop.f32.mrb[6].mxu1 }
 0x806   : > { %v1052_v44 = vrot.slane %v1047_v43, 6  ;;  %v2498_v45 = vpop.f32.mrb[7].mxu1 }
 0x808   : > { %v1054_v46 = vadd.f32 %v1052_v44, %v3378_v58 }
 0x80a   : > { %v2349_v47 = vmul.f32 -1.442695, %v1054_v46 }
 0x80c   : > { %2741 = vpow2.f32 %v2349_v47 }
 0x816   : > { %v2742_v48 = vpop.eup %2741 }
 0x817   : > { %v1058_v49 = vadd.f32 1.0, %v2742_v48 }
 0x819   : > { %2743 = vrcp.f32 %v1058_v49 }
 0x823   : > { %v2744_v50 = vpop.eup %2743 }
 0x824   : > { %v1061_v51 = vmul.f32 2.0, %v2744_v50  ;;  %v1066_v60 = vmul.f32 %v2744_v50, %v1064_v55 }
 0x826   : > { %v2350_v52 = vadd.f32 -1.0, %v1061_v51 }
 0x828   : > { %1068 = vrot.lane.b32.xlu1 %v2350_v52, %s2989_s19 }
 0x89a   : > { %v1069_v53 = vpop.permute.xlu1 %1068 }
 0x89b   : > { %v1071_v54 = vmul.f32 %v2744_v50, %v1069_v53 }
 0x89d   : > { %1073 = vrot.lane.b32.xlu0 %v1071_v54, %s2990_s24 }
 0x90f   : > { %v1074_v61 = vpop.permute.xlu0 %1073 }
 0x910   : > { %v1076_v62 = vadd.f32 %v1074_v61, %v1066_v60 }
 0x912   : > { %2745 = vtanh.f32 %v1076_v62  ;;  %v1184_v21 = vrot.slane %v1076_v62, 7 }
 0x91c   : > { %v2746_v63 = vpop.eup %2745 }
 0x91d   : > { %1079 = vrot.lane.b32.xlu1 %v2746_v63, %s2989_s19 }
 0x98f   : > { %v1080_v2 = vpop.permute.xlu1 %1079 }
 0x990   : > { %v3418_v5 = vmul.f32 %v2744_v50, %v1080_v2 }
 0x992   : > { %v1096_v6 = vrot.slane %v3418_v5, 2 }
 0x994   : > { %1097 = vrot.lane.b32.xlu0 %v1096_v6, %s2990_s24 }
 0xa06   : > { %v1098_v7 = vpop.permute.xlu0 %1097 }
 0xa07   : > { %2508 = vmatmul.mubr.msk.f32.vlgmr.msra.gmra.mrb[4].mxu0 %vm738_vm13, %v1098_v7 }
 0xa08   : > { %2615 = vmatpush3.bf16.msra.mxu0 %v3336_v36  ;;  %2529 = vmatprep.mubr.msk.f32.mxu0 %vm2987_vm0, %v2988_v1 }
 0xa09   : > { %2616 = vmatprep.subr.bf16.mxu0 %v2986_v0 }
 0xa0c   : > { %2618 = vmatpush3.bf16.msra.mxu0 %v3346_v39 }
 0xa0d   : > { %2625 = vmatprep.subr.bf16.mxu0 %v2986_v0 }
 0xada   : > { %v1167_v8 = vpop.f32.mrb[4].mxu0 }
 0xadb   : > { %v1172_v9 = vrot.slane %v1167_v8, 5  ;;  %v2509_v10 = vpop.f32.mrb[5].mxu0 }
 0xadd   : > { %v1174_v11 = vadd.f32 %v1172_v9, %v3380_v59 }
 0xadf   : > { %v2352_v12 = vmul.f32 -1.442695, %v1174_v11 }
 0xae1   : > { %2747 = vpow2.f32 %v2352_v12 }
 0xaeb   : > { %v2748_v13 = vpop.eup %2747 }
 0xaec   : > { %v1178_v14 = vadd.f32 1.0, %v2748_v13 }
 0xaee   : > { %2749 = vrcp.f32 %v1178_v14 }
 0xaf8   : > { %v2750_v15 = vpop.eup %2749 }
 0xaf9   : > { %v1181_v16 = vmul.f32 2.0, %v2750_v15  ;;  %v1186_v22 = vmul.f32 %v2750_v15, %v1184_v21 }
 0xafb   : > { %v2353_v17 = vadd.f32 -1.0, %v1181_v16 }
 0xafd   : > { %1188 = vrot.lane.b32.xlu1 %v2353_v17, %s2989_s19 }
 0xb6f   : > { %v1189_v19 = vpop.permute.xlu1 %1188 }
 0xb70   : > { %v1191_v20 = vmul.f32 %v2750_v15, %v1189_v19 }
 0xb72   : > { %1193 = vrot.lane.b32.xlu0 %v1191_v20, %s2990_s24 }
 0xbe4   : > { %v1194_v23 = vpop.permute.xlu0 %1193 }
 0xbe5   : > { %v1196_v24 = vadd.f32 %v1194_v23, %v1186_v22 }
 0xbe7   : > { %2751 = vtanh.f32 %v1196_v24  ;;  %v1301_v45 = vrot.slane %v1196_v24, 7 }
 0xbf1   : > { %v2752_v25 = vpop.eup %2751 }
 0xbf2   : > { %1199 = vrot.lane.b32.xlu1 %v2752_v25, %s2989_s19 }
 0xc64   : > { %v1200_v26 = vpop.permute.xlu1 %1199 }
 0xc65   : > { %v3433_v27 = vmul.f32 %v2750_v15, %v1200_v26 }
 0xc67   : > { %v1213_v28 = vrot.slane %v3433_v27, 3 }
 0xc69   : > { %1214 = vrot.lane.b32.xlu0 %v1213_v28, %s2990_s24 }
 0xcdb   : > { %v1215_v29 = vpop.permute.xlu0 %1214 }
 0xcdc   : > { %2519 = vmatmul.mubr.msk.f32.vlgmr.msra.gmra.mrb[8].mxu1 %vm738_vm13, %v1215_v29 }
 0xcdd   : > { %2621 = vmatpush3.bf16.msra.mxu1 %v3336_v36  ;;  %2540 = vmatprep.mubr.msk.f32.mxu1 %vm2987_vm0, %v2988_v1 }
 0xcde   : > { %2622 = vmatprep.subr.bf16.mxu1 %v2986_v0 }
 0xce1   : > { %2624 = vmatpush3.bf16.msra.mxu1 %v3346_v39 }
 0xce2   : > { %2631 = vmatprep.subr.bf16.mxu1 %v2986_v0 }
 0xdaf   : > { %v1284_v30 = vpop.f32.mrb[8].mxu1 }
 0xdb0   : > { %v1289_v31 = vrot.slane %v1284_v30, 4  ;;  %v2520_v32 = vpop.f32.mrb[9].mxu1 }
 0xdb2   : > { %v1291_v33 = vadd.f32 %v1289_v31, %v3374_v56 }
 0xdb4   : > { %v2355_v34 = vmul.f32 -1.442695, %v1291_v33 }
 0xdb6   : > { %2753 = vpow2.f32 %v2355_v34 }
 0xdc0   : > { %v2754_v35 = vpop.eup %2753 }
 0xdc1   : > { %v1295_v37 = vadd.f32 1.0, %v2754_v35 }
 0xdc3   : > { %2755 = vrcp.f32 %v1295_v37 }
 0xdcd   : > { %v2756_v38 = vpop.eup %2755 }
 0xdce   : > { %v1298_v41 = vmul.f32 2.0, %v2756_v38  ;;  %v1303_v46 = vmul.f32 %v2756_v38, %v1301_v45 }
 0xdd0   : > { %v2356_v42 = vadd.f32 -1.0, %v1298_v41 }
 0xdd2   : > { %1305 = vrot.lane.b32.xlu1 %v2356_v42, %s2989_s19 }
 0xe44   : > { %v1306_v43 = vpop.permute.xlu1 %1305 }
 0xe45   : > { %v1308_v44 = vmul.f32 %v2756_v38, %v1306_v43 }
 0xe47   : > { %1310 = vrot.lane.b32.xlu0 %v1308_v44, %s2990_s24 }
 0xeb9   : > { %v1311_v47 = vpop.permute.xlu0 %1310 }
 0xeba   : > { %v1313_v48 = vadd.f32 %v1311_v47, %v1303_v46 }
 0xebc   : > { %2757 = vtanh.f32 %v1313_v48 }
 0xec6   : > { %v2758_v56 = vpop.eup %2757 }
 0xec7   : > { %1316 = vrot.lane.b32.xlu1 %v2758_v56, %s2989_s19 }
 0xf39   : > { %v1317_v49 = vpop.permute.xlu1 %1316 }
 0xf3a   : > { %v3448_v50 = vmul.f32 %v2756_v38, %v1317_v49 }
 0xf3c   : > { %v1330_v51 = vrot.slane %v3448_v50, 4 }
 0xf3e   : > { %1331 = vrot.lane.b32.xlu0 %v1330_v51, %s2990_s24 }
 0xfb0   : > { %v1332_v52 = vpop.permute.xlu0 %1331 }
 0xfb1   : > { %2530 = vmatmul.mubr.msk.f32.vlgmr.msra.gmra.mrb[6].mxu0 %vm738_vm13, %v1332_v52 }
 0xfb2   : > { %2627 = vmatpush3.bf16.msra.mxu0 %v3336_v36  ;;  %2551 = vmatprep.mubr.msk.f32.mxu0 %vm2987_vm0, %v2988_v1 }
 0xfb3   : > { %2628 = vmatprep.subr.bf16.mxu0 %v2986_v0 }
 0xfb6   : > { %2630 = vmatpush3.bf16.msra.mxu0 %v3346_v39  ;;  %v1418_v39 = vrot.slane %v1313_v48, 7 }
0x1084   : > { %v1401_v53 = vpop.f32.mrb[6].mxu0 }
0x1085   : > { %v1406_v54 = vrot.slane %v1401_v53, 3  ;;  %v2531_v55 = vpop.f32.mrb[7].mxu0 }
0x1087   : > { %v1408_v60 = vadd.f32 %v1406_v54, %v3376_v57 }
0x1089   : > { %v2358_v61 = vmul.f32 -1.442695, %v1408_v60 }
0x108b   : > { %2759 = vpow2.f32 %v2358_v61 }
0x1095   : > { %v2760_v62 = vpop.eup %2759 }
0x1096   : > { %v1412_v63 = vadd.f32 1.0, %v2760_v62 }
0x1098   : > { %2761 = vrcp.f32 %v1412_v63 }
0x10a2   : > { %v2762_v2 = vpop.eup %2761 }
0x10a3   : > { %v1415_v6 = vmul.f32 2.0, %v2762_v2  ;;  %v1420_v9 = vmul.f32 %v2762_v2, %v1418_v39 }
0x10a5   : > { %v2359_v36 = vadd.f32 -1.0, %v1415_v6 }
0x10a7   : > { %1422 = vrot.lane.b32.xlu1 %v2359_v36, %s2989_s19 }
0x1119   : > { %v1423_v7 = vpop.permute.xlu1 %1422 }
0x111a   : > { %v1425_v8 = vmul.f32 %v2762_v2, %v1423_v7 }
0x111c   : > { %1427 = vrot.lane.b32.xlu0 %v1425_v8, %s2990_s24 }
0x118e   : > { %v1428_v10 = vpop.permute.xlu0 %1427 }
0x118f   : > { %v1430_v11 = vadd.f32 %v1428_v10, %v1420_v9 }
0x1191   : > { %2763 = vtanh.f32 %v1430_v11  ;;  %v1535_v30 = vrot.slane %v1430_v11, 7 }
0x119b   : > { %v2764_v57 = vpop.eup %2763 }
0x119c   : > { %1433 = vrot.lane.b32.xlu1 %v2764_v57, %s2989_s19 }
0x120e   : > { %v1434_v12 = vpop.permute.xlu1 %1433 }
0x120f   : > { %v3462_v13 = vmul.f32 %v2762_v2, %v1434_v12  ;;  %v1682_v12 = vld [vmem:[%s3816_s8] sm:$0xff] }
0x1211   : > { %v1447_v14 = vrot.slane %v3462_v13, 5 }
0x1213   : > { %1448 = vrot.lane.b32.xlu0 %v1447_v14, %s2990_s24 }
0x1285   : > { %v1449_v15 = vpop.permute.xlu0 %1448 }
0x1286   : > { %2541 = vmatmul.mubr.msk.f32.vlgmr.msra.gmra.mrb[10].mxu1 %vm738_vm13, %v1449_v15 }
0x1287   : > { %2558 = vmatprep.mubr.msk.f32.mxu1 %vm2987_vm0, %v2988_v1 }
0x1359   : > { %v1518_v16 = vpop.f32.mrb[10].mxu1 }
0x135a   : > { %v1523_v17 = vrot.slane %v1518_v16, 2  ;;  %v2542_v19 = vpop.f32.mrb[11].mxu1 }
0x135b   : > { %v3544_v19 = vld [vmem:[%s3818_s10] sm:$0x1f] }
0x135c   : > { %v1525_v20 = vadd.f32 %v1523_v17, %v3378_v58 }
0x135e   : > { %v2361_v21 = vmul.f32 -1.442695, %v1525_v20  ;;  %v2992_v20 = vmov -10000.0  }
0x1360   : > { %2765 = vpow2.f32 %v2361_v21  ;;  %v1842_v21 = vsel %vm1841_vm8, 0.0, %v2992_v20 }
0x136a   : > { %v2766_v22 = vpop.eup %2765 }
0x136b   : > { %v1529_v23 = vadd.f32 1.0, %v2766_v22  ;;  %v3549_v22 = vadd.f32 %v1842_v21, %v3544_v19 }
0x136d   : > { %2767 = vrcp.f32 %v1529_v23  ;;  %v1845_v23 = vsel %vm1844_vm9, %v3549_v22, -inf }
0x1377   : > { %v2768_v24 = vpop.eup %2767 }
0x1378   : > { %v1532_v25 = vmul.f32 2.0, %v2768_v24  ;;  %v1537_v31 = vmul.f32 %v2768_v24, %v1535_v30 }
0x137a   : > { %v2362_v26 = vadd.f32 -1.0, %v1532_v25 }
0x137c   : > { %1539 = vrot.lane.b32.xlu1 %v2362_v26, %s2989_s19 }
0x13ee   : > { %v1540_v28 = vpop.permute.xlu1 %1539 }
0x13ef   : > { %v1542_v29 = vmul.f32 %v2768_v24, %v1540_v28  ;;  %v2368_v28 = vld [vmem:[%s3817_s9] ss:$0 sm:$0xff] }
0x13f1   : > { %1544 = vrot.lane.b32.xlu0 %v1542_v29, %s2990_s24 }
0x1463   : > { %v1545_v32 = vpop.permute.xlu0 %1544 }
0x1464   : > { %v1547_v33 = vadd.f32 %v1545_v32, %v1537_v31  ;;  %v1923_v31 = vsub.s32 2, %v3238_v3  ;;  %v1868_v32 = vsub.s32 0, %v3238_v3 }
0x1466   : > { %2769 = vtanh.f32 %v1547_v33 }
0x1470   : > { %v2770_v58 = vpop.eup %2769 }
0x1471   : > { %1550 = vrot.lane.b32.xlu1 %v2770_v58, %s2989_s19 }
0x14e3   : > { %v1551_v34 = vpop.permute.xlu1 %1550 }
0x14e4   : > { %v3473_v35 = vmul.f32 %v2768_v24, %v1551_v34 }
0x14e6   : > { %v1564_v37 = vrot.slane %v3473_v35, 6 }
0x14e8   : > { %1565 = vrot.lane.b32.xlu0 %v1564_v37, %s2990_s24  ;;  %v2033_v37 = vsub.s32 6, %v3238_v3 }
0x155a   : > { %v1566_v38 = vpop.permute.xlu0 %1565 }
0x155b   : > { %2552 = vmatmul.mubr.msk.f32.vlgmr.msra.gmra.mrb[8].mxu0 %vm738_vm13, %v1566_v38  ;;  %vm2065_vm13 = vcmask 39943  }
0x162e   : > { %v1635_v41 = vpop.f32.mrb[8].mxu0 }
0x162f   : > { %v1640_v42 = vrot.slane %v1635_v41, 1  ;;  %v2553_v43 = vpop.f32.mrb[9].mxu0 }
0x1631   : > { %v1642_v44 = vadd.f32 %v1640_v42, %v3380_v59  ;;  %v1652_v59 = vrot.slane %v1547_v33, 7  ;;  %v1978_v33 = vsub.s32 4, %v3238_v3 }
0x1633   : > { %v2364_v45 = vmul.f32 -1.442695, %v1642_v44 }
0x1635   : > { %2771 = vpow2.f32 %v2364_v45 }
0x163f   : > { %v2772_v46 = vpop.eup %2771 }
0x1640   : > { %v1646_v47 = vadd.f32 1.0, %v2772_v46 }
0x1642   : > { %2773 = vrcp.f32 %v1646_v47 }
0x164c   : > { %v2774_v48 = vpop.eup %2773 }
0x164d   : > { %v1649_v56 = vmul.f32 2.0, %v2774_v48 }
0x164f   : > { %v2365_v49 = vadd.f32 -1.0, %v1649_v56 }
0x1651   : > { %1656 = vrot.lane.b32.xlu1 %v2365_v49, %s2989_s19  ;;  %v431_v49 = vld [vmem:[%s3819_s11] sm:$0x1f] }
0x16c3   : > { %v1657_v51 = vpop.permute.xlu1 %1656 }
0x16c4   : > { %v1659_v52 = vmul.f32 %v2774_v48, %v1657_v51 }
0x16c6   : > { %1661 = vrot.lane.b32.xlu0 %v1659_v52, %s2990_s24 }
0x16ca   : > { %852 = vrot.lane.b32.xlu0 %v3387_v18, %s2991_s4  ;;  %v1654_v18 = vmul.f32 %v2774_v48, %v1652_v59 }
0x16ce   : > { %1089 = vrot.lane.b32.xlu0 %v3418_v5, %s2991_s4 }
0x16d2   : > { %1326 = vrot.lane.b32.xlu0 %v3448_v50, %s2991_s4 }
0x16d6   : > { %1560 = vrot.lane.b32.xlu0 %v3473_v35, %s2991_s4 }
0x16da   : > { %964 = vrot.lane.b32.xlu0 %v3403_v40, %s2990_s24 }
0x16de   : > { %1204 = vrot.lane.b32.xlu0 %v3433_v27, %s2990_s24 }
0x16e2   : > { %1438 = vrot.lane.b32.xlu0 %v3462_v13, %s2990_s24 }
0x1738   : > { %v1662_v53 = vpop.permute.xlu0 %1661 }
0x1739   : > { %v1664_v54 = vadd.f32 %v1662_v53, %v1654_v18 }
0x173b   : > { %2775 = vtanh.f32 %v1664_v54 }
0x173c   : > { %v853_v55 = vpop.permute.xlu0 %852 }
0x173d   : > { %855 = vst.msk [vmem:[#allocation3 + $0x7] sm:$0x1] %vm850_vm14, %v853_v55 }
0x1740   : > { %v1090_v60 = vpop.permute.xlu0 %1089 }
0x1741   : > { %1092 = vst.msk [vmem:[#allocation3 + $0x3] sm:$0x4] %vm1087_vm15, %v1090_v60 }
0x1744   : > { %v1327_v61 = vpop.permute.xlu0 %1326 }
0x1745   : > { %v2776_v62 = vpop.eup %2775  ;;  %1329 = vst.msk [vmem:[#allocation3 - $0x1] sm:$0x10] %vm1324_vm1, %v1327_v61 }
0x1746   : > { %1667 = vrot.lane.b32.xlu1 %v2776_v62, %s2989_s19 }
0x1748   : > { %v1561_v63 = vpop.permute.xlu0 %1560 }
0x1749   : > { %1563 = vst.msk [vmem:[#allocation3 - $0x5] sm:$0x40] %vm1558_vm2, %v1561_v63  ;;  %v1898_v63 = vsub.s32 1, %v3238_v3 }
0x174a   : > { %969 = vrot.lane.b32.xlu1 %v3403_v40, %s2991_s4  ;;  %v1685_v40 = vld [vmem:[%s3816_s8 + $0x10] sm:$0xff] }
0x174c   : > { %v965_v2 = vpop.permute.xlu0 %964 }
0x174d   : > { %968 = vst.msk [vmem:[#allocation2] sm:$0x2] %vm967_vm3, %v965_v2 }
0x174e   : > { %1209 = vrot.lane.b32.xlu1 %v3433_v27, %s2991_s4  ;;  %v1686_v27 = vld [vmem:[%s3816_s8 + $0x18] sm:$0xff] }
0x174f   : > { %v2632_v7 = vpack.c.bf16 %v1686_v27, %v1685_v40 }
0x1750   : > { %v1205_v6 = vpop.permute.xlu0 %1204 }
0x1751   : > { %1208 = vst.msk [vmem:[#allocation2] sm:$0x8] %vm1207_vm4, %v1205_v6  ;;  %2633 = vmatpush3.bf16.msra.mxu1 %v2632_v7 }
0x1752   : > { %1443 = vrot.lane.b32.xlu1 %v3462_v13, %s2991_s4  ;;  %2634 = vmatprep.subr.bf16.mxu1 %v2986_v0  ;;  %v1683_v13 = vld [vmem:[%s3816_s8 + $0x8] sm:$0xff] }
0x1753   : > { %v2635_v15 = vpack.c.bf16 %v1683_v13, %v1682_v12  ;;  %v1953_v12 = vsub.s32 3, %v3238_v3 }
0x1754   : > { %v1439_v36 = vpop.permute.xlu0 %1438 }
0x1755   : > { %1442 = vst.msk [vmem:[#allocation2] sm:$0x20] %vm1441_vm5, %v1439_v36 }
0x1756   : > { %1084 = vrot.lane.b32.xlu1 %v3418_v5, %s2990_s24 }
0x175a   : > { %1321 = vrot.lane.b32.xlu1 %v3448_v50, %s2990_s24 }
0x17b8   : > { %v1668_v8 = vpop.permute.xlu1 %1667 }
0x17b9   : > { %v1670_v39 = vmul.f32 %v2774_v48, %v1668_v8 }
0x17bb   : > { %1672 = vrot.lane.b32.xlu0 %v1670_v39, %s2990_s24  ;;  %1677 = vrot.lane.b32.xlu1 %v1670_v39, %s2991_s4 }
0x17bc   : > { %v970_v5 = vpop.permute.xlu1 %969 }
0x17bd   : > { %972 = vst.msk [vmem:[#allocation3 + $0x5] sm:$0x2] %vm967_vm3, %v970_v5 }
0x17bf   : > { %1555 = vrot.lane.b32.xlu1 %v3473_v35, %s2990_s24 }
0x17c0   : > { %v1210_v50 = vpop.permute.xlu1 %1209 }
0x17c1   : > { %1212 = vst.msk [vmem:[#allocation3 + $0x1] sm:$0x8] %vm1207_vm4, %v1210_v50 }
0x17c4   : > { %v1444_v9 = vpop.permute.xlu1 %1443 }
0x17c5   : > { %1446 = vst.msk [vmem:[#allocation3 - $0x3] sm:$0x20] %vm1441_vm5, %v1444_v9 }
0x17c8   : > { %v1085_v10 = vpop.permute.xlu1 %1084 }
0x17c9   : > { %1088 = vst.msk [vmem:[#allocation2] sm:$0x4] %vm1087_vm15, %v1085_v10 }
0x17cc   : > { %v1322_v0 = vpop.permute.xlu1 %1321 }
0x17cd   : > { %1325 = vst.msk [vmem:[#allocation2] sm:$0x10] %vm1324_vm1, %v1322_v0 }
0x17e3   : > { %1846 = vmax.xlane.f32.xlu1 %v1845_v23 }
0x182d   : > { %v1678_v11 = vpop.permute.xlu1 %1677  ;;  %v1673_v57 = vpop.permute.xlu0 %1672 }
0x182e   : > { %1680 = vst.msk [vmem:[#allocation3 - $0x7] sm:$0x80] %vm1675_vm7, %v1678_v11  ;;  %1676 = vst.msk [vmem:[#allocation2] sm:$0x80] %vm1675_vm7, %v1673_v57 }
0x1831   : > { %v1556_v14 = vpop.permute.xlu1 %1555 }
0x1832   : > { %1559 = vst.msk [vmem:[#allocation2] sm:$0x40] %vm1558_vm2, %v1556_v14 }
0x1835   : > { %v1684_v16 = vld [vmem:[#allocation3] sm:$0xff] }
0x1836   : > { %2559 = vmatmul.mubr.msk.f32.vlgmr.msra.gmra.mrb[12].mxu1 %vm588_vm12, %v1684_v16 }
0x1837   : > { %2636 = vmatpush3.bf16.msra.mxu1 %v2635_v15  ;;  %2565 = vmatprep.mubr.msk.f32.mxu1 %vm2987_vm0, %v2988_v1  ;;  %vm1865_vm0 = vcmp.eq.s32.totalorder %v3238_v3, %v3246_v4 }
0x1839   : > { %v1681_v17 = vld [vmem:[#allocation2] sm:$0xff] }
0x183a   : > { %2566 = vmatmul.mubr.msk.f32.vlgmr.msra.gmra.mrb[14].mxu1 %vm588_vm12, %v1681_v17 }
0x1870   : > { %v3593_v56 = vpop.xlane.xlu1 %1846 }
0x1909   : > { %v1756_v24 = vpop.f32.mrb[12].mxu1 }
0x190a   : > { %v2560_v25 = vpop.f32.mrb[13].mxu1 }
0x190d   : > { %v1829_v26 = vpop.f32.mrb[14].mxu1 }
0x190e   : > { %v1830_v29 = vadd.f32 %v1829_v26, %v1756_v24  ;;  %v2567_v30 = vpop.f32.mrb[15].mxu1 }
0x1910   : > { %v3566_v58 = vadd.f32 %v2368_v28, %v1830_v29 }
0x1912   : > { %v1924_v1 = vrot.slane %v3566_v58, %v1923_v31  ;;  %v1869_v34 = vrot.slane %v3566_v58, %v1868_v32  ;;  %v1979_v35 = vrot.slane %v3566_v58, %v1978_v33  ;;  %2214 = vst [vmem:[%s3556_s21] sm:$0xff] %v3566_v58  ;;  %v2034_v45 = vrot.slane %v3566_v58, %v2033_v37 }
0x1913   : > { %v2008_v32 = vsub.s32 5, %v3238_v3 }
0x1914   : > { %v1925_v38 = vsel %vm1865_vm0, %v1924_v1, 0.0  ;;  %v1870_v41 = vsel %vm1865_vm0, %v1869_v34, 0.0  ;;  %v1980_v44 = vsel %vm1865_vm0, %v1979_v35, 0.0  ;;  %v2035_v47 = vsel %vm1865_vm0, %v2034_v45, 0.0 }
0x1915   : > { %v1926_v42 = vsel %vm1844_vm9, %v1925_v38, 0.0  ;;  %v1871_v43 = vsel %vm1844_vm9, %v1870_v41, 0.0  ;;  %v1981_v46 = vsel %vm1844_vm9, %v1980_v44, 0.0  ;;  %v2036_v48 = vsel %vm1844_vm9, %v2035_v47, 0.0 }
0x1916   : > { %1927 = vadd.xlane.f32.xlu1 %v1926_v42  ;;  %1872 = vadd.xlane.f32.xlu0 %v1871_v43 }
0x191a   : > { %1982 = vadd.xlane.f32.xlu1 %v1981_v46 }
0x191e   : > { %2037 = vadd.xlane.f32.xlu1 %v2036_v48 }
0x19a3   : > { %v1873_v51 = vpop.xlane.xlu0 %1872  ;;  %v1928_v27 = vpop.xlane.xlu1 %1927 }
0x19a4   : > { %v1874_v52 = vadd.f32 %v1873_v51, %v3593_v56 }
0x19a6   : > { %v3599_v59 = vadd.f32 %v1874_v52, %v431_v49  ;;  %v2062_v52 = vrot.slane %v3544_v19, 5 }
0x19a7   : > { %v1983_v17 = vpop.xlane.xlu1 %1982 }
0x19a8   : > { %v1876_v18 = vsel %vm1844_vm9, %v3599_v59, -inf }
0x19a9   : > { %v1877_v53 = vrot.slane %v1876_v18, 4 }
0x19ab   : > { %v1878_v54 = vmax.f32 %v1876_v18, %v1877_v53  ;;  %v2038_v37 = vpop.xlane.xlu1 %2037 }
0x19ad   : > { %v1879_v55 = vrot.slane %v1878_v54, 2 }
0x19af   : > { %v1880_v60 = vmax.f32 %v1878_v54, %v1879_v55 }
0x19b1   : > { %v1881_v61 = vrot.slane %v1880_v60, 1 }
0x19b3   : > { %v3603_v62 = vmax.f32 %v1880_v60, %v1881_v61 }
0x19b5   : > { %vm1883_vm6 = vcmp.eq.f32.partialorder %v3599_v59, %v3603_v62  ;;  %v1895_v2 = vadd.f32 %v3603_v62, %v3566_v58 }
0x19b7   : > { %v1899_v6 = vrot.slane %v1895_v2, %v1898_v63 }
0x19b9   : > { %v3611_v36 = vadd.f32 %v1899_v6, %v3544_v19 }
0x19bb   : > { %v1901_v40 = vsel %vm1844_vm9, %v3611_v36, -inf }
0x19bc   : > { %1902 = vmax.xlane.f32.xlu0 %v1901_v40 }
0x1a49   : > { %v3615_v7 = vpop.xlane.xlu0 %1902 }
0x1a4a   : > { %v1929_v8 = vadd.f32 %v1928_v27, %v3615_v7 }
0x1a4c   : > { %v3618_v39 = vadd.f32 %v1929_v8, %v431_v49 }
0x1a4e   : > { %v1931_v5 = vsel %vm1844_vm9, %v3618_v39, -inf }
0x1a4f   : > { %v1932_v50 = vrot.slane %v1931_v5, 4 }
0x1a51   : > { %v1933_v9 = vmax.f32 %v1931_v5, %v1932_v50 }
0x1a53   : > { %v1934_v10 = vrot.slane %v1933_v9, 2 }
0x1a55   : > { %v1935_v0 = vmax.f32 %v1933_v9, %v1934_v10 }
0x1a57   : > { %v1936_v11 = vrot.slane %v1935_v0, 1 }
0x1a59   : > { %v3622_v57 = vmax.f32 %v1935_v0, %v1936_v11 }
0x1a5b   : > { %vm1938_vm10 = vcmp.eq.f32.partialorder %v3618_v39, %v3622_v57  ;;  %v1950_v13 = vadd.f32 %v3622_v57, %v3566_v58 }
0x1a5d   : > { %v1954_v14 = vrot.slane %v1950_v13, %v1953_v12 }
0x1a5f   : > { %v3630_v15 = vadd.f32 %v1954_v14, %v3544_v19 }
0x1a61   : > { %v1956_v16 = vsel %vm1844_vm9, %v3630_v15, -inf }
0x1a62   : > { %1957 = vmax.xlane.f32.xlu0 %v1956_v16 }
0x1aef   : > { %v3634_v20 = vpop.xlane.xlu0 %1957 }
0x1af0   : > { %v1984_v21 = vadd.f32 %v1983_v17, %v3634_v20  ;;  %vm1959_vm4 = vcmp.eq.f32.partialorder %v3630_v15, %v3634_v20 }
0x1af2   : > { %v3637_v23 = vadd.f32 %v1984_v21, %v431_v49 }
0x1af4   : > { %v1986_v24 = vsel %vm1844_vm9, %v3637_v23, -inf }
0x1af5   : > { %v1987_v25 = vrot.slane %v1986_v24, 4 }
0x1af7   : > { %v1988_v26 = vmax.f32 %v1986_v24, %v1987_v25  ;;  %v1960_v25 = vsel %vm1959_vm4, %v3246_v4, 5 }
0x1af9   : > { %v1989_v28 = vrot.slane %v1988_v26, 2 }
0x1afb   : > { %v1990_v29 = vmax.f32 %v1988_v26, %v1989_v28 }
0x1afd   : > { %v1991_v30 = vrot.slane %v1990_v29, 1 }
0x1aff   : > { %v3641_v31 = vmax.f32 %v1990_v29, %v1991_v30  ;;  %v3673_v30 = vsel %vm1844_vm9, %v1960_v25, 2147483647 }
0x1b01   : > { %vm1993_vm11 = vcmp.eq.f32.partialorder %v3637_v23, %v3641_v31  ;;  %v2005_v33 = vadd.f32 %v3641_v31, %v3566_v58 }
0x1b03   : > { %v2009_v1 = vrot.slane %v2005_v33, %v2008_v32 }
0x1b05   : > { %v2010_v34 = vadd.f32 %v2009_v1, %v3544_v19 }
0x1b07   : > { %v2011_v35 = vsel %vm1844_vm9, %v2010_v34, -inf }
0x1b08   : > { %2012 = vmax.xlane.f32.xlu0 %v2011_v35  ;;  %v1963_v35 = vshra.s32 %v3673_v30, 16 }
0x1b95   : > { %v2013_v38 = vpop.xlane.xlu0 %2012 }
0x1b96   : > { %v2039_v41 = vadd.f32 %v2038_v37, %v2013_v38  ;;  %vm2014_vm14 = vcmp.eq.f32.partialorder %v2010_v34, %v2013_v38  ;;  %v1965_v38 = vcvt.s32.f32 %v1963_v35 }
0x1b98   : > { %v2040_v42 = vadd.f32 %v2039_v41, %v431_v49  ;;  %v2015_v49 = vsel %vm2014_vm14, %v3246_v4, 5 }
0x1b99   : > { %v2016_v19 = vsel %vm1844_vm9, %v2015_v49, 2147483647 }
0x1b9a   : > { %v2041_v43 = vsel %vm1844_vm9, %v2040_v42, -inf  ;;  %v2018_v2 = vshra.s32 %v2016_v19, 16  ;;  %v2017_v20 = vand.u32 65535, %v2016_v19 }
0x1b9b   : > { %v2042_v44 = vrot.slane %v2041_v43, 4 }
0x1b9c   : > { %v2020_v6 = vcvt.s32.f32 %v2018_v2  ;;  %v2019_v37 = vcvt.s32.f32 %v2017_v20 }
0x1b9d   : > { %v2043_v45 = vmax.f32 %v2041_v43, %v2042_v44 }
0x1b9f   : > { %v2044_v46 = vrot.slane %v2043_v45, 2 }
0x1ba1   : > { %v2045_v47 = vmax.f32 %v2043_v45, %v2044_v46 }
0x1ba3   : > { %v2046_v48 = vrot.slane %v2045_v47, 1 }
0x1ba5   : > { %v2047_v51 = vmax.f32 %v2045_v47, %v2046_v48 }
0x1ba7   : > { %vm2048_vm12 = vcmp.eq.f32.partialorder %v2040_v42, %v2047_v51  ;;  %v2060_v18 = vadd.f32 %v2047_v51, %v3566_v58  ;;  %v1994_v42 = vsel %vm1993_vm11, %v3238_v3, 5  ;;  %vm2107_vm11 = vcmask 1044480  }
0x1ba8   : > { %v2049_v50 = vsel %vm2048_vm12, %v3238_v3, 5  ;;  %v1995_v43 = vsel %vm1844_vm9, %v1994_v42, 2147483647 }
0x1ba9   : > { %v2064_v53 = vadd.f32 %v2062_v52, %v2060_v18  ;;  %v2050_v9 = vsel %vm1844_vm9, %v2049_v50, 2147483647  ;;  %v1996_v44 = vrot.slane %v1995_v43, 4  ;;  %v2103_v52 = vsub.s32 7, %v3238_v3 }
0x1baa   : > { %v2051_v10 = vrot.slane %v2050_v9, 4 }
0x1bab   : > { %v2066_v54 = vsel %vm2065_vm13, %v2064_v53, -inf  ;;  %vm1997_vm12 = vcmp.lt.s32.totalorder %v1995_v43, %v1996_v44 }
0x1bac   : > { %2067 = vmax.xlane.f32.xlu0 %v2066_v54  ;;  %vm2052_vm2 = vcmp.lt.s32.totalorder %v2050_v9, %v2051_v10  ;;  %v1998_v54 = vsel %vm1997_vm12, %v1995_v43, %v1996_v44 }
0x1bad   : > { %v2053_v0 = vsel %vm2052_vm2, %v2050_v9, %v2051_v10  ;;  %v1999_v19 = vrot.slane %v1998_v54, 2  ;;  %vm2117_vm2 = vcmask 39936  }
0x1bae   : > { %v2054_v11 = vrot.slane %v2053_v0, 2 }
0x1baf   : > { %vm2000_vm14 = vcmp.lt.s32.totalorder %v1998_v54, %v1999_v19 }
0x1bb0   : > { %vm2055_vm3 = vcmp.lt.s32.totalorder %v2053_v0, %v2054_v11 }
0x1bb1   : > { %v2056_v12 = vsel %vm2055_vm3, %v2053_v0, %v2054_v11 }
0x1bb2   : > { %v2057_v14 = vrot.slane %v2056_v12, 1 }
0x1bb4   : > { %vm2058_vm5 = vcmp.lt.s32.totalorder %v2056_v12, %v2057_v14 }
0x1bb5   : > { %v2059_v26 = vsel %vm2058_vm5, %v2056_v12, %v2057_v14 }
0x1c39   : > { %v3655_v55 = vpop.xlane.xlu0 %2067 }
0x1c3a   : > { %vm2069_vm15 = vcmp.eq.f32.partialorder %v2064_v53, %v3655_v55 }
0x1c3b   : > { %v2070_v60 = vsel %vm2069_vm15, %v3246_v4, 5  ;;  %vm1904_vm15 = vcmp.eq.f32.partialorder %v3611_v36, %v3615_v7  ;;  %v1962_v7 = vand.u32 65535, %v3673_v30 }
0x1c3c   : > { %v2071_v61 = vsel %vm2065_vm13, %v2070_v60, 2147483647  ;;  %v1905_v10 = vsel %vm1904_vm15, %v3246_v4, 5 }
0x1c3d   : > { %v2073_v63 = vshra.s32 %v2071_v61, 16  ;;  %v2072_v40 = vand.u32 65535, %v2071_v61 }
0x1c3f   : > { %v2075_v58 = vcvt.s32.f32 %v2073_v63  ;;  %v2074_v8 = vcvt.s32.f32 %v2072_v40  ;;  %v2001_v40 = vsel %vm2000_vm14, %v1998_v54, %v1999_v19 }
0x1c41   : > { %2076 = vmin.xlane.f32.xlu1 %v2075_v58 }
0x1c45   : > { %2021 = vmin.xlane.f32.xlu1 %v2020_v6 }
0x1cce   : > { %v2077_v27 = vpop.xlane.xlu1 %2076 }
0x1ccf   : > { %vm2078_vm1 = vcmp.eq.f32.partialorder %v2075_v58, %v2077_v27  ;;  %v2083_v13 = vcvt.f32.s32 %v2077_v27 }
0x1cd0   : > { %v2079_v5 = vsel %vm2078_vm1, %v2074_v8, inf  ;;  %v2002_v8 = vrot.slane %v2001_v40, 1 }
0x1cd1   : > { %2080 = vmin.xlane.f32.xlu0 %v2079_v5  ;;  %v2084_v17 = vshll.u32 %v2083_v13, 16  ;;  %v3696_v13 = vsel %vm1844_vm9, %v1905_v10, 2147483647  ;;  %v1884_v10 = vsel %vm1883_vm6, %v3238_v3, 5 }
0x1cd2   : > { %v2022_v15 = vpop.xlane.xlu1 %2021  ;;  %vm2003_vm1 = vcmp.lt.s32.totalorder %v2001_v40, %v2002_v8  ;;  %v1908_v25 = vshra.s32 %v3696_v13, 16 }
0x1cd3   : > { %vm2023_vm0 = vcmp.eq.f32.partialorder %v2020_v6, %v2022_v15  ;;  %v2028_v47 = vcvt.f32.s32 %v2022_v15  ;;  %v2004_v0 = vsel %vm2003_vm1, %v2001_v40, %v2002_v8 }
0x1cd4   : > { %v2024_v41 = vsel %vm2023_vm0, %v2019_v37, inf  ;;  %vm1848_vm0 = vcmp.eq.f32.partialorder %v3549_v22, %v3593_v56  ;;  %v1907_v22 = vand.u32 65535, %v3696_v13 }
0x1cd5   : > { %v2029_v49 = vshll.u32 %v2028_v47, 16 }
0x1cd6   : > { %v1909_v8 = vcvt.s32.f32 %v1907_v22 }
0x1d5e   : > { %v2081_v16 = vpop.xlane.xlu0 %2080 }
0x1d5f   : > { %v2082_v21 = vcvt.f32.s32 %v2081_v16 }
0x1d61   : > { %v3666_v24 = vadd.s32 %v2084_v17, %v2082_v21 }
0x1d63   : > { %vm2086_vm7 = vcmp.eq.s32.totalorder %v3246_v4, %v3666_v24 }
0x1d64   : > { %v2087_v28 = vsel %vm2086_vm7, %v2059_v26, 0  ;;  %v1964_v26 = vcvt.s32.f32 %v1962_v7 }
0x1d65   : > { %v2088_v29 = vsel %vm2065_vm13, %v2087_v28, 0  ;;  %v1910_v28 = vcvt.s32.f32 %v1908_v25 }
0x1d66   : > { %v2090_v32 = vshrl.u32 %v2088_v29, 16  ;;  %v2089_v33 = vand.u32 65535, %v2088_v29 }
0x1d68   : > { %v2092_v1 = vcvt.s32.f32 %v2090_v32  ;;  %v2091_v34 = vcvt.s32.f32 %v2089_v33  ;;  %v1939_v32 = vsel %vm1938_vm10, %v3238_v3, 5 }
0x1d69   : > { %v1940_v33 = vsel %vm1844_vm9, %v1939_v32, 2147483647 }
0x1d6a   : > { %2095 = vadd.xlane.f32.xlu0 %v2092_v1  ;;  %2093 = vadd.xlane.f32.xlu1 %v2091_v34  ;;  %v1941_v30 = vrot.slane %v1940_v33, 4 }
0x1d6c   : > { %vm1942_vm5 = vcmp.lt.s32.totalorder %v1940_v33, %v1941_v30 }
0x1d6e   : > { %2025 = vmin.xlane.f32.xlu0 %v2024_v41  ;;  %1966 = vmin.xlane.f32.xlu1 %v1965_v38 }
0x1df7   : > { %v2096_v45 = vpop.xlane.xlu0 %2095  ;;  %v2094_v46 = vpop.xlane.xlu1 %2093 }
0x1df8   : > { %v2098_v48 = vcvt.f32.s32 %v2096_v45  ;;  %v2097_v18 = vcvt.f32.s32 %v2094_v46 }
0x1dfa   : > { %v2099_v51 = vshll.u32 %v2098_v48, 16 }
0x1dfb   : > { %v2026_v53 = vpop.xlane.xlu0 %2025  ;;  %v1967_v36 = vpop.xlane.xlu1 %1966 }
0x1dfc   : > { %v3682_v60 = vadd.s32 %v2099_v51, %v2097_v18  ;;  %v2027_v61 = vcvt.f32.s32 %v2026_v53  ;;  %vm1968_vm4 = vcmp.eq.f32.partialorder %v1965_v38, %v1967_v36  ;;  %v1973_v1 = vcvt.f32.s32 %v1967_v36 }
0x1dfd   : > { %v1969_v29 = vsel %vm1968_vm4, %v1964_v26, inf  ;;  %v1943_v38 = vsel %vm1942_vm5, %v1940_v33, %v1941_v30 }
0x1dfe   : > { %v2104_v23 = vrot.slane %v3682_v60, %v2103_v52  ;;  %v2030_v31 = vadd.s32 %v2029_v49, %v2027_v61  ;;  %v1974_v42 = vshll.u32 %v1973_v1, 16  ;;  %v1944_v45 = vrot.slane %v1943_v38, 2 }
0x1dff   : > { %v1849_v61 = vsel %vm1848_vm0, %v3246_v4, 5  ;;  %vm2202_vm0 = vcmp.eq.s32.totalorder %v3246_v4, 4 }
0x1e00   : > { %vm2105_vm13 = vcmp.eq.s32.totalorder %v3238_v3, %v2104_v23  ;;  %vm1945_vm7 = vcmp.lt.s32.totalorder %v1943_v38, %v1944_v45 }
0x1e01   : > { %v2106_v63 = vsel %vm2105_vm13, %v2030_v31, 0  ;;  %v1946_v51 = vsel %vm1945_vm7, %v1943_v38, %v1944_v45  ;;  %vm2197_vm7 = vcmp.eq.s32.totalorder %v3246_v4, 2 }
0x1e02   : > { %v2108_v58 = vsel %vm2107_vm11, %v2106_v63, 0  ;;  %v1947_v18 = vrot.slane %v1946_v51, 1  ;;  %v1850_v63 = vsel %vm1844_vm9, %v1849_v61, 2147483647 }
0x1e03   : > { %v2109_v2 = vrot.slane %v2108_v58, 4 }
0x1e04   : > { %vm1948_vm12 = vcmp.lt.s32.totalorder %v1946_v51, %v1947_v18 }
0x1e05   : > { %v2110_v6 = vadd.s32 %v2109_v2, %v2108_v58  ;;  %v1949_v23 = vsel %vm1948_vm12, %v1946_v51, %v1947_v18  ;;  %vm2205_vm12 = vcmp.eq.s32.totalorder %v3246_v4, 5 }
0x1e07   : > { %v2111_v27 = vrot.slane %v2110_v6, 2 }
0x1e09   : > { %v2112_v5 = vadd.s32 %v2111_v27, %v2110_v6  ;;  %v1852_v27 = vshra.s32 %v1850_v63, 16 }
0x1e0b   : > { %v2113_v50 = vrot.slane %v2112_v5, 1 }
0x1e0d   : > { %v3689_v9 = vadd.s32 %v2113_v50, %v2112_v5  ;;  %v1854_v5 = vcvt.s32.f32 %v1852_v27 }
0x1e0f   : > { %vm2115_vm3 = vcmp.eq.s32.totalorder %v3246_v4, %v3689_v9 }
0x1e10   : > { %v2116_v11 = vsel %vm2115_vm3, %v2004_v0, 0  ;;  %v1885_v0 = vsel %vm1844_vm9, %v1884_v10, 2147483647 }
0x1e11   : > { %v2118_v12 = vsel %vm2117_vm2, %v2116_v11, 0  ;;  %v1886_v11 = vrot.slane %v1885_v0, 4 }
0x1e12   : > { %v2120_v14 = vshrl.u32 %v2118_v12, 16  ;;  %v2119_v16 = vand.u32 65535, %v2118_v12 }
0x1e13   : > { %vm1887_vm15 = vcmp.lt.s32.totalorder %v1885_v0, %v1886_v11 }
0x1e14   : > { %v2122_v17 = vcvt.s32.f32 %v2120_v14  ;;  %v2121_v21 = vcvt.s32.f32 %v2119_v16  ;;  %v1888_v36 = vsel %vm1887_vm15, %v1885_v0, %v1886_v11  ;;  %v2206_v11 = vcvt.s32.f32 %v3689_v9 }
0x1e16   : > { %2125 = vadd.xlane.f32.xlu0 %v2122_v17  ;;  %2123 = vadd.xlane.f32.xlu1 %v2121_v21 }
0x1e1a   : > { %1970 = vmin.xlane.f32.xlu0 %v1969_v29  ;;  %1911 = vmin.xlane.f32.xlu1 %v1910_v28  ;;  %v1889_v29 = vrot.slane %v1888_v36, 2 }
0x1e1c   : > { %vm1890_vm9 = vcmp.lt.s32.totalorder %v1888_v36, %v1889_v29 }
0x1ea3   : > { %v2126_v15 = vpop.xlane.xlu0 %2125  ;;  %v2124_v20 = vpop.xlane.xlu1 %2123 }
0x1ea4   : > { %v2128_v34 = vcvt.f32.s32 %v2126_v15  ;;  %v2127_v37 = vcvt.f32.s32 %v2124_v20  ;;  %v1891_v15 = vsel %vm1890_vm9, %v1888_v36, %v1889_v29 }
0x1ea5   : > { %v1892_v1 = vrot.slane %v1891_v15, 1 }
0x1ea6   : > { %v2129_v35 = vshll.u32 %v2128_v34, 16 }
0x1ea7   : > { %v1971_v41 = vpop.xlane.xlu0 %1970  ;;  %v1912_v6 = vpop.xlane.xlu1 %1911  ;;  %vm1893_vm6 = vcmp.lt.s32.totalorder %v1891_v15, %v1892_v1 }
0x1ea8   : > { %v3705_v43 = vadd.s32 %v2129_v35, %v2127_v37  ;;  %v1972_v44 = vcvt.f32.s32 %v1971_v41  ;;  %vm1913_vm14 = vcmp.eq.f32.partialorder %v1910_v28, %v1912_v6  ;;  %v1918_v14 = vcvt.f32.s32 %v1912_v6 }
0x1ea9   : > { %v1914_v50 = vsel %vm1913_vm14, %v1909_v8, inf  ;;  %v1894_v38 = vsel %vm1893_vm6, %v1891_v15, %v1892_v1 }
0x1eaa   : > { %vm2131_vm10 = vcmp.eq.s32.totalorder %v3238_v3, %v3705_v43  ;;  %v1975_v39 = vadd.s32 %v1974_v42, %v1972_v44  ;;  %v1919_v25 = vshll.u32 %v1918_v14, 16  ;;  %v2212_v14 = vcvt.s32.f32 %v3666_v24 }
0x1eac   : > { %v2132_v57 = vsel %vm2131_vm10, %v1975_v39, 0  ;;  %vm2188_vm10 = vcmp.eq.s32.totalorder %v3246_v4, 0 }
0x1ead   : > { %v2133_v46 = vsel %vm2107_vm11, %v2132_v57, 0  ;;  %v1851_v57 = vand.u32 65535, %v1850_v63  ;;  %v2189_v24 = vsel %vm2188_vm10, %v3655_v55, 0.0 }
0x1eae   : > { %v2134_v47 = vrot.slane %v2133_v46, 4 }
0x1eb0   : > { %v2135_v48 = vadd.s32 %v2134_v47, %v2133_v46 }
0x1eb2   : > { %v2136_v52 = vrot.slane %v2135_v48, 2 }
0x1eb4   : > { %v2137_v53 = vadd.s32 %v2136_v52, %v2135_v48  ;;  %v1853_v48 = vcvt.s32.f32 %v1851_v57 }
0x1eb6   : > { %v2138_v54 = vrot.slane %v2137_v53, 1 }
0x1eb8   : > { %v3712_v49 = vadd.s32 %v2138_v54, %v2137_v53 }
0x1eba   : > { %vm2140_vm13 = vcmp.eq.s32.totalorder %v3246_v4, %v3712_v49  ;;  %v2200_v8 = vcvt.s32.f32 %v3712_v49 }
0x1ebb   : > { %v2141_v31 = vsel %vm2140_vm13, %v1949_v23, 0  ;;  %vm2208_vm13 = vcmp.eq.s32.totalorder %v3246_v4, 6 }
0x1ebc   : > { %v2142_v19 = vsel %vm2117_vm2, %v2141_v31, 0 }
0x1ebd   : > { %v2144_v58 = vshrl.u32 %v2142_v19, 16  ;;  %v2143_v2 = vand.u32 65535, %v2142_v19 }
0x1ebf   : > { %v2146_v56 = vcvt.s32.f32 %v2144_v58  ;;  %v2145_v40 = vcvt.s32.f32 %v2143_v2 }
0x1ec1   : > { %2149 = vadd.xlane.f32.xlu0 %v2146_v56  ;;  %2147 = vadd.xlane.f32.xlu1 %v2145_v40 }
0x1ec5   : > { %1855 = vmin.xlane.f32.xlu1 %v1854_v5  ;;  %1915 = vmin.xlane.f32.xlu0 %v1914_v50  ;;  %v2203_v50 = vcvt.s32.f32 %v3705_v43 }
0x1f4e   : > { %v2150_v12 = vpop.xlane.xlu0 %2149  ;;  %v2148_v13 = vpop.xlane.xlu1 %2147 }
0x1f4f   : > { %v2152_v16 = vcvt.f32.s32 %v2150_v12  ;;  %v2151_v17 = vcvt.f32.s32 %v2148_v13  ;;  %v2209_v12 = vcvt.s32.f32 %v3682_v60 }
0x1f51   : > { %v2153_v7 = vshll.u32 %v2152_v16, 16 }
0x1f52   : > { %v1916_v21 = vpop.xlane.xlu0 %1915  ;;  %v1856_v39 = vpop.xlane.xlu1 %1855 }
0x1f53   : > { %v2154_v26 = vadd.s32 %v2153_v7, %v2151_v17  ;;  %v1917_v28 = vcvt.f32.s32 %v1916_v21  ;;  %vm1857_vm4 = vcmp.eq.f32.partialorder %v1854_v5, %v1856_v39  ;;  %v1862_v53 = vcvt.f32.s32 %v1856_v39 }
0x1f54   : > { %v1858_v51 = vsel %vm1857_vm4, %v1853_v48, inf }
0x1f55   : > { %vm2155_vm1 = vcmp.eq.s32.totalorder %v3238_v3, %v2154_v26  ;;  %v1920_v59 = vadd.s32 %v1919_v25, %v1917_v28  ;;  %v1863_v19 = vshll.u32 %v1862_v53, 16  ;;  %v2198_v56 = vcvt.s32.f32 %v2154_v26 }
0x1f57   : > { %v2156_v62 = vsel %vm2155_vm1, %v1920_v59, 0 }
0x1f58   : > { %v2157_v32 = vsel %vm2107_vm11, %v2156_v62, 0 }
0x1f59   : > { %v2158_v33 = vrot.slane %v2157_v32, 4 }
0x1f5b   : > { %v2159_v30 = vadd.s32 %v2158_v33, %v2157_v32 }
0x1f5d   : > { %v2160_v20 = vrot.slane %v2159_v30, 2 }
0x1f5f   : > { %v2161_v34 = vadd.s32 %v2160_v20, %v2159_v30 }
0x1f61   : > { %v2162_v35 = vrot.slane %v2161_v34, 1 }
0x1f63   : > { %v2163_v37 = vadd.s32 %v2162_v35, %v2161_v34 }
0x1f65   : > { %vm2164_vm3 = vcmp.eq.s32.totalorder %v3246_v4, %v2163_v37  ;;  %v2195_v22 = vcvt.s32.f32 %v2163_v37 }
0x1f66   : > { %v2165_v41 = vsel %vm2164_vm3, %v1894_v38, 0 }
0x1f67   : > { %v2166_v42 = vsel %vm2117_vm2, %v2165_v41, 0  ;;  %vm2190_vm2 = vcmp.eq.s32.totalorder %v3246_v4, 1 }
0x1f68   : > { %v2168_v44 = vshrl.u32 %v2166_v42, 16  ;;  %v2167_v45 = vand.u32 65535, %v2166_v42 }
0x1f6a   : > { %v2170_v46 = vcvt.s32.f32 %v2168_v44  ;;  %v2169_v47 = vcvt.s32.f32 %v2167_v45 }
0x1f6c   : > { %2173 = vadd.xlane.f32.xlu0 %v2170_v46  ;;  %2171 = vadd.xlane.f32.xlu1 %v2169_v47 }
0x1f70   : > { %1859 = vmin.xlane.f32.xlu0 %v1858_v51 }
0x1ff9   : > { %v2174_v52 = vpop.xlane.xlu0 %2173  ;;  %v2172_v18 = vpop.xlane.xlu1 %2171 }
0x1ffa   : > { %v2176_v54 = vcvt.f32.s32 %v2174_v52  ;;  %v2175_v23 = vcvt.f32.s32 %v2172_v18 }
0x1ffc   : > { %v2177_v61 = vshll.u32 %v2176_v54, 16 }
0x1ffd   : > { %v1860_v31 = vpop.xlane.xlu0 %1859 }
0x1ffe   : > { %v2178_v58 = vadd.s32 %v2177_v61, %v2175_v23  ;;  %v1861_v2 = vcvt.f32.s32 %v1860_v31 }
0x2000   : > { %vm2179_vm5 = vcmp.eq.s32.totalorder %v3238_v3, %v2178_v58  ;;  %v2193_v63 = vcvt.s32.f32 %v2178_v58  ;;  %v1864_v6 = vadd.s32 %v1863_v19, %v1861_v2 }
0x2002   : > { %v2194_v40 = vsel %vm2188_vm10, %v2193_v63, 0.0  ;;  %v2180_v27 = vsel %vm2179_vm5, %v1864_v6, 0 }
0x2003   : > { %v2196_v5 = vsel %vm2190_vm2, %v2195_v22, %v2194_v40  ;;  %v2181_v3 = vsel %vm2107_vm11, %v2180_v27, 0  ;;  %vm2211_vm11 = vcmp.eq.s32.totalorder %v3246_v4, 7 }
0x2004   : > { %v2199_v10 = vsel %vm2197_vm7, %v2198_v56, %v2196_v5  ;;  %v2182_v0 = vrot.slane %v2181_v3, 4 }
0x2005   : > { %v2201_v49 = vsel %vm1841_vm8, %v2200_v8, %v2199_v10 }
0x2006   : > { %v2204_v13 = vsel %vm2202_vm0, %v2203_v50, %v2201_v49  ;;  %v2183_v43 = vadd.s32 %v2182_v0, %v2181_v3 }
0x2007   : > { %v2207_v16 = vsel %vm2205_vm12, %v2206_v11, %v2204_v13 }
0x2008   : > { %v2210_v36 = vsel %vm2208_vm13, %v2209_v12, %v2207_v16  ;;  %v2184_v7 = vrot.slane %v2183_v43, 2 }
0x2009   : > { %v2213_v9 = vsel %vm2211_vm11, %v2212_v14, %v2210_v36 }
0x200a   : > { %v2185_v17 = vadd.s32 %v2184_v7, %v2183_v43  ;;  %2216 = vst [vmem:[%s3556_s21 + $0x2] sm:$0x80] %v2213_v9 }
0x200c   : > { %v2186_v21 = vrot.slane %v2185_v17, 1 }
0x200e   : > { %v2187_v25 = vadd.s32 %v2186_v21, %v2185_v17 }
0x2010   : > { %v2191_v60 = vcvt.s32.f32 %v2187_v25 }
0x2012   : > { %v2192_v26 = vsel %vm2190_vm2, %v2191_v60, %v2189_v24 }
0x2013   : > { %2215 = vst [vmem:[%s3556_s21 + $0x1] sm:$0x80] %v2192_v26 }
0x2014   : > { %2914 = shalt.err (!%p2911_p4)
}
0x2015   : > { %s2915_s14 = scalar_lea.hbm %s3755_s26, 256  ;;  %s2919_s21 = scalar_lea.hbm %s3820_s12, 512 }
0x2016   : > { %p2916_p6 = scmp.ne.s32.totalorder %s3755_s26, %s2915_s14  ;;  %p2920_p10 = scmp.lt.u32.totalorder %s3755_s26, %s3820_s12 }
0x2017   : > { %p2921_p0 = scmp.lt.u32.totalorder %s2919_s21, %s2915_s14  ;;  %p2923_p1 = scmp.lt.u32.totalorder %s2915_s14, %s3755_s26 }
0x2018   : > { %p2917_p5 = pnand %p2916_p6, %p3850_p7 }
0x2019   : > { %p2922_p3 = por %p2921_p0, %p2920_p10 }
0x201a   : > { %p2918_p11 = pneg %p2917_p5 }
0x201b   : > { %p2924_p8 = por %p2923_p1, %p2922_p3 }
0x201d   : > { %p2925_p9 = pnand %p2924_p8, %p2918_p11 }
0x201f   : > { %2928 = shalt.err (!%p2925_p9)
}
0x2020   : > { %s2994_s24 = smov 128   ;;  %s2995_s4 = smov 8  }
0x2021   : > { %2653 = dma.vmem_to_hbm [thread:$0]  (%p3850_p7), %s3757_s25, 256, %s3755_s26, %s3767_s29, %s2994_s24, %s2994_s24, %s2995_s4  }
0x2022 PF: > { %s3851_s13 = sld [smem:[#allocation20_spill]]  ;;  %s3852_s27 = sld [smem:[#allocation24_spill]] }
0x2023   : > { %p2680_p12 = scmp.ge.s32.totalorder %s2977_s28, 2 }
0x2028   : > { %s2247_s23 = sand.u32 1, %s3851_s13   ;;  %p3853_p13 = scmp.ne.s32.totalorder %s3852_s27, 0 }
0x2029   : > { %s2248_s18 = scalar_lea.sflag [#allocation8], %s2247_s23 }
0x202a   : > { %p2669_p2 = pnand %p2680_p12, %p3853_p13 }
0x202c   : > { %2960 = dma.done.wait (!%p2669_p2), %s2248_s18, 256  }
0x202d   : > { %2962 = vsyncadd (!%p2669_p2), %s2248_s18, 4294967040  ;;  %s3854_s28 = sld [smem:[#allocation22_spill]]  ;;  %s3855_s22 = sld [smem:[#allocation21_spill]] }
0x202e   : > { %s3856_s27 = sld [smem:[#allocation23_spill]]  ;;  %s3857_s26 = smov %s2969_s0 }
0x2033   : > { %p31_p4 = scmp.ge.s32.totalorder %s3854_s28, 4   ;;  %s3858_s0 = smov %s3855_s22 }
0x2035   :  { %33 = sbr.rel (!%p31_p4) target bundleno = 22 (0x16), region = 113 }
0x203c   :  { %2253 = vsyncpa [#allocation7], 1 }
0x203d   :  { %2255 = vsyncpa [#allocation7 + $0x1], 1 }
0x203e   :  { %2256 = vsyncpa [#allocation10], 1 }
0x203f   :  { %2257 = vsyncpa [#allocation13], 1 }
0x2040   :  { %2258 = vsyncpa [#allocation8], 1 }
0x2041   :  { %2260 = vsyncpa [#allocation8 + $0x1], 1 }

</bundles_post_ra>
